<compile_context>
chip_gen: v5e
topology: v5e:2x2
jax: 0.10.0
libtpu: 0.0.40
codegen_flags: <defaults>
</compile_context>

<pallas_src>
import functools
import math

import jax
import jax.numpy as jnp
from jax import lax
from jax.experimental import pallas as pl
from jax.experimental.pallas import tpu as pltpu

_LANE = 128


def _round_up(v, m):
    return (v + m - 1) // m * m


# ------------------------------ fused kernel --------------------------------


def fused_gnn_kernel(
    x_ref,        # [N, Dp]   f32 node features, zero-padded to Dp lanes
    mask_ref,     # [N, N]    f32 additive mask: 0 if edge j->i else -1e30
    rowmask_ref,  # [N, 1]    f32: 1 if node has >=1 incoming edge else 0
    pool_ref,     # [G, N]    f32 mean-pool matrix (onehot * 1/count folded in)
    w_ref,        # [L, Dp, (3H+1)*Dp] bf16 packed [Wq|Wk|Wv|Ws]; scale & 1/H folded in
    b_ref,        # [L, 1, (3H+1)*Dp]  f32 packed biases (scale & 1/H folded in)
    lng_ref,      # [max(L-1,1), 1, Dp] f32 LayerNorm gammas (0 on pad lanes)
    lnb_ref,      # [max(L-1,1), 1, Dp] f32 LayerNorm betas  (0 on pad lanes)
    wpost_ref,    # [Dp, 128]  bf16 post_mp weight, zero-padded to 128 lanes
    bpost_ref,    # [1, 128]   f32 post_mp bias, zero-padded
    o_ref,        # [G, 128]   f32 lane-dense output (prediction in lane 0)
    *,
    heads,
    hidden,
    dpad,
    num_layers,
    eps,
):
    f32 = jnp.float32
    bf16 = jnp.bfloat16

    x = x_ref[...]                 # [N, Dp] f32
    mask_add = mask_ref[...]       # [N, N]  f32, the only N^2 resident object
    row_mask = rowmask_ref[...]    # [N, 1]  f32
    inv_hidden = f32(1.0 / hidden)

    hd = heads * dpad

    for l in range(num_layers):
        xb = x.astype(bf16)
        # Single fused Q/K/V/skip projection (bf16 operands, f32 accumulation).
        proj = jnp.dot(xb, w_ref[l], preferred_element_type=f32) + b_ref[l]
        skip = proj[:, 3 * hd : 3 * hd + dpad]                       # [N, Dp]

        acc = jnp.zeros_like(skip)
        for h in range(heads):
            q = proj[:, h * dpad : (h + 1) * dpad].astype(bf16)
            k = proj[:, hd + h * dpad : hd + (h + 1) * dpad].astype(bf16)
            v = proj[:, 2 * hd + h * dpad : 2 * hd + (h + 1) * dpad].astype(bf16)

            # scores (1/sqrt(D) already folded into Wq); -1e30 additive on non-edges.
            s = (
                lax.dot_general(
                    q, k, (((1,), (1,)), ((), ())), preferred_element_type=f32
                )
                + mask_add
            )
            m = jnp.max(s, axis=-1, keepdims=True)
            p = jnp.exp(s - m)               # non-edges underflow to exactly 0
            denom = jnp.sum(p, axis=-1, keepdims=True)   # always >= 1 (argmax term)
            alpha = (p * pl.reciprocal(denom, approx=True)).astype(bf16)
            acc = acc + jnp.dot(alpha, v, preferred_element_type=f32)

        # 1/heads folded into Wv/bv; rows with no incoming edges get no message term.
        x = jnp.maximum(acc * row_mask + skip, 0.0)

        # Dropout is identity in eval mode. LayerNorm on all but the last layer.
        if l != num_layers - 1:
            g = lng_ref[l]                    # [1, Dp], zero on pad lanes
            bb = lnb_ref[l]                   # [1, Dp], zero on pad lanes
            # Pad lanes of x are exactly zero, so full-width sums == hidden-width sums.
            mu = jnp.sum(x, axis=-1, keepdims=True) * inv_hidden
            ex2 = jnp.sum(x * x, axis=-1, keepdims=True) * inv_hidden
            var = jnp.maximum(ex2 - mu * mu, 0.0)
            x = (x - mu) * (lax.rsqrt(var + eps) * g) + bb   # pad lanes stay 0

    # global_mean_pool (1/count folded into pool matrix) + post_mp Linear (lane padded).
    pooled = jnp.dot(
        pool_ref[...].astype(bf16), x.astype(bf16), preferred_element_type=f32
    )
    o_ref[...] = (
        jnp.dot(pooled.astype(bf16), wpost_ref[...], preferred_element_type=f32)
        + bpost_ref[...]
    )


# ------------------------------ param packing --------------------------------


def pack_params(params, input_dim, hidden, heads, num_layers, dpad):
    """Fold scale / head-mean into weights, 128-lane-pad every head slab, cast to bf16."""
    scale = 1.0 / math.sqrt(hidden)
    inv_h = 1.0 / heads

    def pad_heads_w(w):   # [fin, heads*hidden] -> [dpad, heads*dpad]
        fin = w.shape[0]
        w = w.reshape(fin, heads, hidden)
        w = jnp.pad(w, ((0, dpad - fin), (0, 0), (0, dpad - hidden)))
        return w.reshape(dpad, heads * dpad)

    def pad_heads_b(b):   # [1, heads*hidden] -> [1, heads*dpad]
        b = b.reshape(1, heads, hidden)
        b = jnp.pad(b, ((0, 0), (0, 0), (0, dpad - hidden)))
        return b.reshape(1, heads * dpad)

    def pad_skip_w(w):    # [fin, hidden] -> [dpad, dpad]
        fin = w.shape[0]
        return jnp.pad(w, ((0, dpad - fin), (0, dpad - hidden)))

    w_list, b_list = [], []
    for l in range(num_layers):
        p = params["convs"][l]
        wq = pad_heads_w(p["Wq"] * scale)
        bq = pad_heads_b(p["bq"] * scale)
        wk = pad_heads_w(p["Wk"])
        bk = pad_heads_b(p["bk"])
        wv = pad_heads_w(p["Wv"] * inv_h)
        bv = pad_heads_b(p["bv"] * inv_h)
        ws = pad_skip_w(p["Ws"])
        bs = jnp.pad(p["bs"], ((0, 0), (0, dpad - hidden)))
        w_list.append(jnp.concatenate([wq, wk, wv, ws], axis=1))   # [dpad, (3H+1)*dpad]
        b_list.append(jnp.concatenate([bq, bk, bv, bs], axis=1))   # [1, (3H+1)*dpad]
    w_all = jnp.stack(w_list).astype(jnp.bfloat16)   # [L, dpad, (3H+1)*dpad]
    b_all = jnp.stack(b_list).astype(jnp.float32)    # [L, 1, (3H+1)*dpad]

    n_ln = max(num_layers - 1, 1)
    lng = jnp.stack(
        [jnp.pad(params["lns"][i][0], ((0, 0), (0, dpad - hidden))) for i in range(n_ln)]
    )
    lnb = jnp.stack(
        [jnp.pad(params["lns"][i][1], ((0, 0), (0, dpad - hidden))) for i in range(n_ln)]
    )

    wpost, bpost = params["post_mp"]                              # [hidden, 1], [1, 1]
    wpost_p = jnp.pad(
        wpost, ((0, dpad - hidden), (0, _LANE - wpost.shape[1]))
    ).astype(jnp.bfloat16)                                        # [dpad, 128]
    bpost_p = jnp.pad(bpost, ((0, 0), (0, _LANE - bpost.shape[1])))  # [1, 128]
    return w_all, b_all, lng, lnb, wpost_p, bpost_p


# ------------------------------ call wrapper ---------------------------------


def gnnreg_forward(x, adj, onehot, params, *, heads, hidden, num_layers):
    n, fin = x.shape
    g = onehot.shape[0]
    dpad = _round_up(hidden, _LANE)
    assert fin <= dpad, "layer-0 fan-in padding assumes input_dim <= padded hidden"

    x_pad = jnp.pad(x.astype(jnp.float32), ((0, 0), (0, dpad - fin)))
    # Additive mask + row mask + mean-pool matrix are cheap host-side glue.
    mask_add = jnp.where(adj > 0, 0.0, -1e30).astype(jnp.float32)          # [N, N]
    row_mask = (jnp.sum(adj, axis=1, keepdims=True) > 0).astype(jnp.float32)
    counts = jnp.sum(onehot, axis=1, keepdims=True)
    pool = (onehot / jnp.where(counts > 0, counts, 1.0)).astype(jnp.float32)  # [G, N]

    w_all, b_all, lng, lnb, wpost, bpost = pack_params(
        params, fin, hidden, heads, num_layers, dpad
    )

    kern = functools.partial(
        fused_gnn_kernel,
        heads=heads,
        hidden=hidden,
        dpad=dpad,
        num_layers=num_layers,
        eps=1e-5,
    )

    inputs = (x_pad, mask_add, row_mask, pool, w_all, b_all, lng, lnb, wpost, bpost)

    # Scoped-VMEM limit sized from the resident set (inputs + a few N^2 / N*Dp temps),
    # clamped to stay within physical VMEM on every chip (64 MiB on v7x).
    resident = sum(int(a.size) * a.dtype.itemsize for a in inputs)
    resident += 4 * n * n * 4 + 8 * n * dpad * 4 + g * _LANE * 4
    vmem_limit = int(min(64 * 1024 * 1024, max(32 * 1024 * 1024, 2 * resident)))

    out_pad = pl.pallas_call(
        kern,
        out_shape=jax.ShapeDtypeStruct((g, _LANE), jnp.float32),
        in_specs=[pl.BlockSpec(memory_space=pltpu.MemorySpace.VMEM)] * len(inputs),
        out_specs=pl.BlockSpec(memory_space=pltpu.MemorySpace.VMEM),
        compiler_params=pltpu.CompilerParams(vmem_limit_bytes=vmem_limit),
    )(*inputs)
    return out_pad[:, :1]   # prediction lives in lane 0


# --------------------------------- params ------------------------------------


def init_linear(key, fin, fout, scale=0.1):
    kw, kb = jax.random.split(key)
    w = scale * jax.random.normal(kw, (fin, fout), jnp.float32)
    b = scale * jax.random.normal(kb, (1, fout), jnp.float32)
    return w, b


def init_params(key, input_dim, hidden, heads, num_layers):
    convs = []
    # __init__ builds num_layers + 1 convs (the last one is unused in forward).
    for l in range(num_layers + 1):
        fin = input_dim if l == 0 else hidden
        key, k1, k2, k3, k4 = jax.random.split(key, 5)
        Wq, bq = init_linear(k1, fin, heads * hidden)
        Wk, bk = init_linear(k2, fin, heads * hidden)
        Wv, bv = init_linear(k3, fin, heads * hidden)
        Ws, bs = init_linear(k4, fin, hidden)
        convs.append(dict(Wq=Wq, bq=bq, Wk=Wk, bk=bk, Wv=Wv, bv=bv, Ws=Ws, bs=bs))
    lns = [
        (jnp.ones((1, hidden), jnp.float32), jnp.zeros((1, hidden), jnp.float32))
        for _ in range(num_layers)
    ]
    key, kmp = jax.random.split(key)
    post_mp = init_linear(kmp, hidden, 1)
    return dict(convs=convs, lns=lns, post_mp=post_mp)


# ---------------------------------- main --------------------------------------

if __name__ == "__main__":
    N, INPUT_DIM, HIDDEN, HEADS, NUM_LAYERS, G = 16, 8, 32, 2, 3, 2

    key = jax.random.PRNGKey(0)
    key, kx = jax.random.split(key)
    x = jax.random.normal(kx, (N, INPUT_DIM), jnp.float32)

    # Deterministic edge_index: directed ring (both directions) within each graph of 8 nodes.
    src_list, dst_list = [], []
    for gph in range(G):
        off = gph * 8
        for i in range(8):
            src_list += [off + i, off + (i + 1) % 8]
            dst_list += [off + (i + 1) % 8, off + i]
    edge_index = jnp.array([src_list, dst_list], dtype=jnp.int32)  # [2, 32]

    # Dense adjacency (glue, plain JAX): adj[i, j] = 1 iff edge j -> i.
    adj = jnp.zeros((N, N), jnp.float32).at[edge_index[1], edge_index[0]].set(1.0)

    batch = jnp.array([0] * 8 + [1] * 8, dtype=jnp.int32)
    onehot = (batch[None, :] == jnp.arange(G)[:, None]).astype(jnp.float32)  # [G, N]

    params = init_params(key, INPUT_DIM, HIDDEN, HEADS, NUM_LAYERS)

    out = gnnreg_forward(
        x, adj, onehot, params,
        heads=HEADS, hidden=HIDDEN, num_layers=NUM_LAYERS,
    )
    jax.block_until_ready(out)
    assert out.shape == (G, 1)
    print("KERNEL_OK")
</pallas_src>

<mosaic_0001>
module attributes {stable_mosaic.version = 11 : i64} {
  func.func @fused_gnn_kernel(%arg0: memref<16x128xf32, #tpu.memory_space<vmem>>, %arg1: memref<16x16xf32, #tpu.memory_space<vmem>>, %arg2: memref<16x1xf32, #tpu.memory_space<vmem>>, %arg3: memref<2x16xf32, #tpu.memory_space<vmem>>, %arg4: memref<3x128x896xbf16, #tpu.memory_space<vmem>>, %arg5: memref<3x1x896xf32, #tpu.memory_space<vmem>>, %arg6: memref<2x1x128xf32, #tpu.memory_space<vmem>>, %arg7: memref<2x1x128xf32, #tpu.memory_space<vmem>>, %arg8: memref<128x128xbf16, #tpu.memory_space<vmem>>, %arg9: memref<1x128xf32, #tpu.memory_space<vmem>>, %arg10: memref<2x128xf32, #tpu.memory_space<vmem>>) attributes {dimension_semantics = [], scalar_prefetch = 0 : i64, scratch_operands = 0 : i64, tpu.core_type = #tpu.core_type<tc>} {
    %c0 = arith.constant 0 : index
    %c0_0 = arith.constant 0 : index
    %0 = vector.load %arg0[%c0, %c0_0] : memref<16x128xf32, #tpu.memory_space<vmem>>, vector<16x128xf32>
    %c0_1 = arith.constant 0 : index
    %c0_2 = arith.constant 0 : index
    %1 = vector.load %arg1[%c0_1, %c0_2] : memref<16x16xf32, #tpu.memory_space<vmem>>, vector<16x16xf32>
    %c0_3 = arith.constant 0 : index
    %c0_4 = arith.constant 0 : index
    %2 = vector.load %arg2[%c0_3, %c0_4] : memref<16x1xf32, #tpu.memory_space<vmem>>, vector<16x1xf32>
    %3 = arith.truncf %0 : vector<16x128xf32> to vector<16x128xbf16>
    %c0_5 = arith.constant 0 : index
    %c0_6 = arith.constant 0 : index
    %c0_7 = arith.constant 0 : index
    %4 = vector.load %arg4[%c0_5, %c0_6, %c0_7] : memref<3x128x896xbf16, #tpu.memory_space<vmem>>, vector<1x128x896xbf16>
    %5 = vector.shape_cast %4 : vector<1x128x896xbf16> to vector<128x896xbf16>
    %cst = arith.constant dense<0.000000e+00> : vector<16x896xf32>
    %6 = tpu.matmul %3, %5, %cst {dimension_numbers = #tpu.dot_dimension_numbers<[1], [0], [0], [1], [0, 0, 1, 1], [], []>} : vector<16x128xbf16>, vector<128x896xbf16>, vector<16x896xf32> -> vector<16x896xf32>
    %c0_8 = arith.constant 0 : index
    %c0_9 = arith.constant 0 : index
    %c0_10 = arith.constant 0 : index
    %7 = vector.load %arg5[%c0_8, %c0_9, %c0_10] : memref<3x1x896xf32, #tpu.memory_space<vmem>>, vector<1x1x896xf32>
    %8 = vector.shape_cast %7 : vector<1x1x896xf32> to vector<1x896xf32>
    %9 = vector.broadcast %8 : vector<1x896xf32> to vector<16x896xf32>
    %10 = arith.addf %6, %9 : vector<16x896xf32>
    %11 = vector.extract_strided_slice %10 {offsets = [0, 768], sizes = [16, 128], strides = [1, 1]} : vector<16x896xf32> to vector<16x128xf32>
    %cst_11 = arith.constant 0.000000e+00 : f32
    %12 = vector.broadcast %cst_11 : f32 to vector<16x128xf32>
    %13 = vector.extract_strided_slice %10 {offsets = [0, 0], sizes = [16, 128], strides = [1, 1]} : vector<16x896xf32> to vector<16x128xf32>
    %14 = arith.truncf %13 : vector<16x128xf32> to vector<16x128xbf16>
    %15 = vector.extract_strided_slice %10 {offsets = [0, 256], sizes = [16, 128], strides = [1, 1]} : vector<16x896xf32> to vector<16x128xf32>
    %16 = arith.truncf %15 : vector<16x128xf32> to vector<16x128xbf16>
    %17 = vector.extract_strided_slice %10 {offsets = [0, 512], sizes = [16, 128], strides = [1, 1]} : vector<16x896xf32> to vector<16x128xf32>
    %18 = arith.truncf %17 : vector<16x128xf32> to vector<16x128xbf16>
    %cst_12 = arith.constant dense<0.000000e+00> : vector<16x16xf32>
    %19 = tpu.matmul %14, %16, %cst_12 {dimension_numbers = #tpu.dot_dimension_numbers<[1], [1], [0], [0], [0, 0, 1, 0], [], []>} : vector<16x128xbf16>, vector<16x128xbf16>, vector<16x16xf32> -> vector<16x16xf32>
    %20 = arith.addf %19, %1 : vector<16x16xf32>
    %cst_13 = arith.constant dense<0xFF800000> : vector<16xf32>
    %21 = vector.multi_reduction <maximumf>, %20, %cst_13 [1] : vector<16x16xf32> to vector<16xf32>
    %22 = vector.shape_cast %21 : vector<16xf32> to vector<16x1xf32>
    %23 = vector.broadcast %22 : vector<16x1xf32> to vector<16x16xf32>
    %24 = arith.subf %20, %23 : vector<16x16xf32>
    %25 = math.exp %24 : vector<16x16xf32>
    %cst_14 = arith.constant dense<0.000000e+00> : vector<16xf32>
    %26 = vector.multi_reduction <add>, %25, %cst_14 [1] : vector<16x16xf32> to vector<16xf32>
    %27 = vector.shape_cast %26 : vector<16xf32> to vector<16x1xf32>
    %28 = tpu.reciprocal %27 {approx = true} : vector<16x1xf32> -> vector<16x1xf32>
    %29 = vector.broadcast %28 : vector<16x1xf32> to vector<16x16xf32>
    %30 = arith.mulf %25, %29 : vector<16x16xf32>
    %31 = arith.truncf %30 : vector<16x16xf32> to vector<16x16xbf16>
    %cst_15 = arith.constant dense<0.000000e+00> : vector<16x128xf32>
    %32 = tpu.matmul %31, %18, %cst_15 {dimension_numbers = #tpu.dot_dimension_numbers<[1], [0], [0], [1], [0, 0, 1, 1], [], []>} : vector<16x16xbf16>, vector<16x128xbf16>, vector<16x128xf32> -> vector<16x128xf32>
    %33 = arith.addf %12, %32 : vector<16x128xf32>
    %34 = vector.extract_strided_slice %10 {offsets = [0, 128], sizes = [16, 128], strides = [1, 1]} : vector<16x896xf32> to vector<16x128xf32>
    %35 = arith.truncf %34 : vector<16x128xf32> to vector<16x128xbf16>
    %36 = vector.extract_strided_slice %10 {offsets = [0, 384], sizes = [16, 128], strides = [1, 1]} : vector<16x896xf32> to vector<16x128xf32>
    %37 = arith.truncf %36 : vector<16x128xf32> to vector<16x128xbf16>
    %38 = vector.extract_strided_slice %10 {offsets = [0, 640], sizes = [16, 128], strides = [1, 1]} : vector<16x896xf32> to vector<16x128xf32>
    %39 = arith.truncf %38 : vector<16x128xf32> to vector<16x128xbf16>
    %cst_16 = arith.constant dense<0.000000e+00> : vector<16x16xf32>
    %40 = tpu.matmul %35, %37, %cst_16 {dimension_numbers = #tpu.dot_dimension_numbers<[1], [1], [0], [0], [0, 0, 1, 0], [], []>} : vector<16x128xbf16>, vector<16x128xbf16>, vector<16x16xf32> -> vector<16x16xf32>
    %41 = arith.addf %40, %1 : vector<16x16xf32>
    %cst_17 = arith.constant dense<0xFF800000> : vector<16xf32>
    %42 = vector.multi_reduction <maximumf>, %41, %cst_17 [1] : vector<16x16xf32> to vector<16xf32>
    %43 = vector.shape_cast %42 : vector<16xf32> to vector<16x1xf32>
    %44 = vector.broadcast %43 : vector<16x1xf32> to vector<16x16xf32>
    %45 = arith.subf %41, %44 : vector<16x16xf32>
    %46 = math.exp %45 : vector<16x16xf32>
    %cst_18 = arith.constant dense<0.000000e+00> : vector<16xf32>
    %47 = vector.multi_reduction <add>, %46, %cst_18 [1] : vector<16x16xf32> to vector<16xf32>
    %48 = vector.shape_cast %47 : vector<16xf32> to vector<16x1xf32>
    %49 = tpu.reciprocal %48 {approx = true} : vector<16x1xf32> -> vector<16x1xf32>
    %50 = vector.broadcast %49 : vector<16x1xf32> to vector<16x16xf32>
    %51 = arith.mulf %46, %50 : vector<16x16xf32>
    %52 = arith.truncf %51 : vector<16x16xf32> to vector<16x16xbf16>
    %cst_19 = arith.constant dense<0.000000e+00> : vector<16x128xf32>
    %53 = tpu.matmul %52, %39, %cst_19 {dimension_numbers = #tpu.dot_dimension_numbers<[1], [0], [0], [1], [0, 0, 1, 1], [], []>} : vector<16x16xbf16>, vector<16x128xbf16>, vector<16x128xf32> -> vector<16x128xf32>
    %54 = arith.addf %33, %53 : vector<16x128xf32>
    %55 = vector.broadcast %2 : vector<16x1xf32> to vector<16x128xf32>
    %56 = arith.mulf %54, %55 : vector<16x128xf32>
    %57 = arith.addf %56, %11 : vector<16x128xf32>
    %cst_20 = arith.constant 0.000000e+00 : f32
    %58 = vector.broadcast %cst_20 : f32 to vector<16x128xf32>
    %59 = arith.maximumf %57, %58 : vector<16x128xf32>
    %c0_21 = arith.constant 0 : index
    %c0_22 = arith.constant 0 : index
    %c0_23 = arith.constant 0 : index
    %60 = vector.load %arg6[%c0_21, %c0_22, %c0_23] : memref<2x1x128xf32, #tpu.memory_space<vmem>>, vector<1x1x128xf32>
    %61 = vector.shape_cast %60 : vector<1x1x128xf32> to vector<1x128xf32>
    %c0_24 = arith.constant 0 : index
    %c0_25 = arith.constant 0 : index
    %c0_26 = arith.constant 0 : index
    %62 = vector.load %arg7[%c0_24, %c0_25, %c0_26] : memref<2x1x128xf32, #tpu.memory_space<vmem>>, vector<1x1x128xf32>
    %63 = vector.shape_cast %62 : vector<1x1x128xf32> to vector<1x128xf32>
    %cst_27 = arith.constant dense<0.000000e+00> : vector<16xf32>
    %64 = vector.multi_reduction <add>, %59, %cst_27 [1] : vector<16x128xf32> to vector<16xf32>
    %65 = vector.shape_cast %64 : vector<16xf32> to vector<16x1xf32>
    %cst_28 = arith.constant 3.125000e-02 : f32
    %66 = vector.broadcast %cst_28 : f32 to vector<16x1xf32>
    %67 = arith.mulf %65, %66 : vector<16x1xf32>
    %68 = arith.mulf %59, %59 : vector<16x128xf32>
    %cst_29 = arith.constant dense<0.000000e+00> : vector<16xf32>
    %69 = vector.multi_reduction <add>, %68, %cst_29 [1] : vector<16x128xf32> to vector<16xf32>
    %70 = vector.shape_cast %69 : vector<16xf32> to vector<16x1xf32>
    %cst_30 = arith.constant 3.125000e-02 : f32
    %71 = vector.broadcast %cst_30 : f32 to vector<16x1xf32>
    %72 = arith.mulf %70, %71 : vector<16x1xf32>
    %73 = arith.mulf %67, %67 : vector<16x1xf32>
    %74 = arith.subf %72, %73 : vector<16x1xf32>
    %cst_31 = arith.constant 0.000000e+00 : f32
    %75 = vector.broadcast %cst_31 : f32 to vector<16x1xf32>
    %76 = arith.maximumf %74, %75 : vector<16x1xf32>
    %77 = vector.broadcast %67 : vector<16x1xf32> to vector<16x128xf32>
    %78 = arith.subf %59, %77 : vector<16x128xf32>
    %cst_32 = arith.constant 9.99999974E-6 : f32
    %79 = vector.broadcast %cst_32 : f32 to vector<16x1xf32>
    %80 = arith.addf %76, %79 : vector<16x1xf32>
    %81 = math.rsqrt %80 : vector<16x1xf32>
    %82 = vector.broadcast %81 : vector<16x1xf32> to vector<16x128xf32>
    %83 = vector.broadcast %61 : vector<1x128xf32> to vector<16x128xf32>
    %84 = arith.mulf %82, %83 : vector<16x128xf32>
    %85 = arith.mulf %78, %84 : vector<16x128xf32>
    %86 = vector.broadcast %63 : vector<1x128xf32> to vector<16x128xf32>
    %87 = arith.addf %85, %86 : vector<16x128xf32>
    %88 = arith.truncf %87 : vector<16x128xf32> to vector<16x128xbf16>
    %c1 = arith.constant 1 : index
    %c0_33 = arith.constant 0 : index
    %c0_34 = arith.constant 0 : index
    %89 = vector.load %arg4[%c1, %c0_33, %c0_34] : memref<3x128x896xbf16, #tpu.memory_space<vmem>>, vector<1x128x896xbf16>
    %90 = vector.shape_cast %89 : vector<1x128x896xbf16> to vector<128x896xbf16>
    %cst_35 = arith.constant dense<0.000000e+00> : vector<16x896xf32>
    %91 = tpu.matmul %88, %90, %cst_35 {dimension_numbers = #tpu.dot_dimension_numbers<[1], [0], [0], [1], [0, 0, 1, 1], [], []>} : vector<16x128xbf16>, vector<128x896xbf16>, vector<16x896xf32> -> vector<16x896xf32>
    %c1_36 = arith.constant 1 : index
    %c0_37 = arith.constant 0 : index
    %c0_38 = arith.constant 0 : index
    %92 = vector.load %arg5[%c1_36, %c0_37, %c0_38] : memref<3x1x896xf32, #tpu.memory_space<vmem>>, vector<1x1x896xf32>
    %93 = vector.shape_cast %92 : vector<1x1x896xf32> to vector<1x896xf32>
    %94 = vector.broadcast %93 : vector<1x896xf32> to vector<16x896xf32>
    %95 = arith.addf %91, %94 : vector<16x896xf32>
    %96 = vector.extract_strided_slice %95 {offsets = [0, 768], sizes = [16, 128], strides = [1, 1]} : vector<16x896xf32> to vector<16x128xf32>
    %cst_39 = arith.constant 0.000000e+00 : f32
    %97 = vector.broadcast %cst_39 : f32 to vector<16x128xf32>
    %98 = vector.extract_strided_slice %95 {offsets = [0, 0], sizes = [16, 128], strides = [1, 1]} : vector<16x896xf32> to vector<16x128xf32>
    %99 = arith.truncf %98 : vector<16x128xf32> to vector<16x128xbf16>
    %100 = vector.extract_strided_slice %95 {offsets = [0, 256], sizes = [16, 128], strides = [1, 1]} : vector<16x896xf32> to vector<16x128xf32>
    %101 = arith.truncf %100 : vector<16x128xf32> to vector<16x128xbf16>
    %102 = vector.extract_strided_slice %95 {offsets = [0, 512], sizes = [16, 128], strides = [1, 1]} : vector<16x896xf32> to vector<16x128xf32>
    %103 = arith.truncf %102 : vector<16x128xf32> to vector<16x128xbf16>
    %cst_40 = arith.constant dense<0.000000e+00> : vector<16x16xf32>
    %104 = tpu.matmul %99, %101, %cst_40 {dimension_numbers = #tpu.dot_dimension_numbers<[1], [1], [0], [0], [0, 0, 1, 0], [], []>} : vector<16x128xbf16>, vector<16x128xbf16>, vector<16x16xf32> -> vector<16x16xf32>
    %105 = arith.addf %104, %1 : vector<16x16xf32>
    %cst_41 = arith.constant dense<0xFF800000> : vector<16xf32>
    %106 = vector.multi_reduction <maximumf>, %105, %cst_41 [1] : vector<16x16xf32> to vector<16xf32>
    %107 = vector.shape_cast %106 : vector<16xf32> to vector<16x1xf32>
    %108 = vector.broadcast %107 : vector<16x1xf32> to vector<16x16xf32>
    %109 = arith.subf %105, %108 : vector<16x16xf32>
    %110 = math.exp %109 : vector<16x16xf32>
    %cst_42 = arith.constant dense<0.000000e+00> : vector<16xf32>
    %111 = vector.multi_reduction <add>, %110, %cst_42 [1] : vector<16x16xf32> to vector<16xf32>
    %112 = vector.shape_cast %111 : vector<16xf32> to vector<16x1xf32>
    %113 = tpu.reciprocal %112 {approx = true} : vector<16x1xf32> -> vector<16x1xf32>
    %114 = vector.broadcast %113 : vector<16x1xf32> to vector<16x16xf32>
    %115 = arith.mulf %110, %114 : vector<16x16xf32>
    %116 = arith.truncf %115 : vector<16x16xf32> to vector<16x16xbf16>
    %cst_43 = arith.constant dense<0.000000e+00> : vector<16x128xf32>
    %117 = tpu.matmul %116, %103, %cst_43 {dimension_numbers = #tpu.dot_dimension_numbers<[1], [0], [0], [1], [0, 0, 1, 1], [], []>} : vector<16x16xbf16>, vector<16x128xbf16>, vector<16x128xf32> -> vector<16x128xf32>
    %118 = arith.addf %97, %117 : vector<16x128xf32>
    %119 = vector.extract_strided_slice %95 {offsets = [0, 128], sizes = [16, 128], strides = [1, 1]} : vector<16x896xf32> to vector<16x128xf32>
    %120 = arith.truncf %119 : vector<16x128xf32> to vector<16x128xbf16>
    %121 = vector.extract_strided_slice %95 {offsets = [0, 384], sizes = [16, 128], strides = [1, 1]} : vector<16x896xf32> to vector<16x128xf32>
    %122 = arith.truncf %121 : vector<16x128xf32> to vector<16x128xbf16>
    %123 = vector.extract_strided_slice %95 {offsets = [0, 640], sizes = [16, 128], strides = [1, 1]} : vector<16x896xf32> to vector<16x128xf32>
    %124 = arith.truncf %123 : vector<16x128xf32> to vector<16x128xbf16>
    %cst_44 = arith.constant dense<0.000000e+00> : vector<16x16xf32>
    %125 = tpu.matmul %120, %122, %cst_44 {dimension_numbers = #tpu.dot_dimension_numbers<[1], [1], [0], [0], [0, 0, 1, 0], [], []>} : vector<16x128xbf16>, vector<16x128xbf16>, vector<16x16xf32> -> vector<16x16xf32>
    %126 = arith.addf %125, %1 : vector<16x16xf32>
    %cst_45 = arith.constant dense<0xFF800000> : vector<16xf32>
    %127 = vector.multi_reduction <maximumf>, %126, %cst_45 [1] : vector<16x16xf32> to vector<16xf32>
    %128 = vector.shape_cast %127 : vector<16xf32> to vector<16x1xf32>
    %129 = vector.broadcast %128 : vector<16x1xf32> to vector<16x16xf32>
    %130 = arith.subf %126, %129 : vector<16x16xf32>
    %131 = math.exp %130 : vector<16x16xf32>
    %cst_46 = arith.constant dense<0.000000e+00> : vector<16xf32>
    %132 = vector.multi_reduction <add>, %131, %cst_46 [1] : vector<16x16xf32> to vector<16xf32>
    %133 = vector.shape_cast %132 : vector<16xf32> to vector<16x1xf32>
    %134 = tpu.reciprocal %133 {approx = true} : vector<16x1xf32> -> vector<16x1xf32>
    %135 = vector.broadcast %134 : vector<16x1xf32> to vector<16x16xf32>
    %136 = arith.mulf %131, %135 : vector<16x16xf32>
    %137 = arith.truncf %136 : vector<16x16xf32> to vector<16x16xbf16>
    %cst_47 = arith.constant dense<0.000000e+00> : vector<16x128xf32>
    %138 = tpu.matmul %137, %124, %cst_47 {dimension_numbers = #tpu.dot_dimension_numbers<[1], [0], [0], [1], [0, 0, 1, 1], [], []>} : vector<16x16xbf16>, vector<16x128xbf16>, vector<16x128xf32> -> vector<16x128xf32>
    %139 = arith.addf %118, %138 : vector<16x128xf32>
    %140 = vector.broadcast %2 : vector<16x1xf32> to vector<16x128xf32>
    %141 = arith.mulf %139, %140 : vector<16x128xf32>
    %142 = arith.addf %141, %96 : vector<16x128xf32>
    %cst_48 = arith.constant 0.000000e+00 : f32
    %143 = vector.broadcast %cst_48 : f32 to vector<16x128xf32>
    %144 = arith.maximumf %142, %143 : vector<16x128xf32>
    %c1_49 = arith.constant 1 : index
    %c0_50 = arith.constant 0 : index
    %c0_51 = arith.constant 0 : index
    %145 = vector.load %arg6[%c1_49, %c0_50, %c0_51] : memref<2x1x128xf32, #tpu.memory_space<vmem>>, vector<1x1x128xf32>
    %146 = vector.shape_cast %145 : vector<1x1x128xf32> to vector<1x128xf32>
    %c1_52 = arith.constant 1 : index
    %c0_53 = arith.constant 0 : index
    %c0_54 = arith.constant 0 : index
    %147 = vector.load %arg7[%c1_52, %c0_53, %c0_54] : memref<2x1x128xf32, #tpu.memory_space<vmem>>, vector<1x1x128xf32>
    %148 = vector.shape_cast %147 : vector<1x1x128xf32> to vector<1x128xf32>
    %cst_55 = arith.constant dense<0.000000e+00> : vector<16xf32>
    %149 = vector.multi_reduction <add>, %144, %cst_55 [1] : vector<16x128xf32> to vector<16xf32>
    %150 = vector.shape_cast %149 : vector<16xf32> to vector<16x1xf32>
    %cst_56 = arith.constant 3.125000e-02 : f32
    %151 = vector.broadcast %cst_56 : f32 to vector<16x1xf32>
    %152 = arith.mulf %150, %151 : vector<16x1xf32>
    %153 = arith.mulf %144, %144 : vector<16x128xf32>
    %cst_57 = arith.constant dense<0.000000e+00> : vector<16xf32>
    %154 = vector.multi_reduction <add>, %153, %cst_57 [1] : vector<16x128xf32> to vector<16xf32>
    %155 = vector.shape_cast %154 : vector<16xf32> to vector<16x1xf32>
    %cst_58 = arith.constant 3.125000e-02 : f32
    %156 = vector.broadcast %cst_58 : f32 to vector<16x1xf32>
    %157 = arith.mulf %155, %156 : vector<16x1xf32>
    %158 = arith.mulf %152, %152 : vector<16x1xf32>
    %159 = arith.subf %157, %158 : vector<16x1xf32>
    %cst_59 = arith.constant 0.000000e+00 : f32
    %160 = vector.broadcast %cst_59 : f32 to vector<16x1xf32>
    %161 = arith.maximumf %159, %160 : vector<16x1xf32>
    %162 = vector.broadcast %152 : vector<16x1xf32> to vector<16x128xf32>
    %163 = arith.subf %144, %162 : vector<16x128xf32>
    %cst_60 = arith.constant 9.99999974E-6 : f32
    %164 = vector.broadcast %cst_60 : f32 to vector<16x1xf32>
    %165 = arith.addf %161, %164 : vector<16x1xf32>
    %166 = math.rsqrt %165 : vector<16x1xf32>
    %167 = vector.broadcast %166 : vector<16x1xf32> to vector<16x128xf32>
    %168 = vector.broadcast %146 : vector<1x128xf32> to vector<16x128xf32>
    %169 = arith.mulf %167, %168 : vector<16x128xf32>
    %170 = arith.mulf %163, %169 : vector<16x128xf32>
    %171 = vector.broadcast %148 : vector<1x128xf32> to vector<16x128xf32>
    %172 = arith.addf %170, %171 : vector<16x128xf32>
    %173 = arith.truncf %172 : vector<16x128xf32> to vector<16x128xbf16>
    %c2 = arith.constant 2 : index
    %c0_61 = arith.constant 0 : index
    %c0_62 = arith.constant 0 : index
    %174 = vector.load %arg4[%c2, %c0_61, %c0_62] : memref<3x128x896xbf16, #tpu.memory_space<vmem>>, vector<1x128x896xbf16>
    %175 = vector.shape_cast %174 : vector<1x128x896xbf16> to vector<128x896xbf16>
    %cst_63 = arith.constant dense<0.000000e+00> : vector<16x896xf32>
    %176 = tpu.matmul %173, %175, %cst_63 {dimension_numbers = #tpu.dot_dimension_numbers<[1], [0], [0], [1], [0, 0, 1, 1], [], []>} : vector<16x128xbf16>, vector<128x896xbf16>, vector<16x896xf32> -> vector<16x896xf32>
    %c2_64 = arith.constant 2 : index
    %c0_65 = arith.constant 0 : index
    %c0_66 = arith.constant 0 : index
    %177 = vector.load %arg5[%c2_64, %c0_65, %c0_66] : memref<3x1x896xf32, #tpu.memory_space<vmem>>, vector<1x1x896xf32>
    %178 = vector.shape_cast %177 : vector<1x1x896xf32> to vector<1x896xf32>
    %179 = vector.broadcast %178 : vector<1x896xf32> to vector<16x896xf32>
    %180 = arith.addf %176, %179 : vector<16x896xf32>
    %181 = vector.extract_strided_slice %180 {offsets = [0, 768], sizes = [16, 128], strides = [1, 1]} : vector<16x896xf32> to vector<16x128xf32>
    %cst_67 = arith.constant 0.000000e+00 : f32
    %182 = vector.broadcast %cst_67 : f32 to vector<16x128xf32>
    %183 = vector.extract_strided_slice %180 {offsets = [0, 0], sizes = [16, 128], strides = [1, 1]} : vector<16x896xf32> to vector<16x128xf32>
    %184 = arith.truncf %183 : vector<16x128xf32> to vector<16x128xbf16>
    %185 = vector.extract_strided_slice %180 {offsets = [0, 256], sizes = [16, 128], strides = [1, 1]} : vector<16x896xf32> to vector<16x128xf32>
    %186 = arith.truncf %185 : vector<16x128xf32> to vector<16x128xbf16>
    %187 = vector.extract_strided_slice %180 {offsets = [0, 512], sizes = [16, 128], strides = [1, 1]} : vector<16x896xf32> to vector<16x128xf32>
    %188 = arith.truncf %187 : vector<16x128xf32> to vector<16x128xbf16>
    %cst_68 = arith.constant dense<0.000000e+00> : vector<16x16xf32>
    %189 = tpu.matmul %184, %186, %cst_68 {dimension_numbers = #tpu.dot_dimension_numbers<[1], [1], [0], [0], [0, 0, 1, 0], [], []>} : vector<16x128xbf16>, vector<16x128xbf16>, vector<16x16xf32> -> vector<16x16xf32>
    %190 = arith.addf %189, %1 : vector<16x16xf32>
    %cst_69 = arith.constant dense<0xFF800000> : vector<16xf32>
    %191 = vector.multi_reduction <maximumf>, %190, %cst_69 [1] : vector<16x16xf32> to vector<16xf32>
    %192 = vector.shape_cast %191 : vector<16xf32> to vector<16x1xf32>
    %193 = vector.broadcast %192 : vector<16x1xf32> to vector<16x16xf32>
    %194 = arith.subf %190, %193 : vector<16x16xf32>
    %195 = math.exp %194 : vector<16x16xf32>
    %cst_70 = arith.constant dense<0.000000e+00> : vector<16xf32>
    %196 = vector.multi_reduction <add>, %195, %cst_70 [1] : vector<16x16xf32> to vector<16xf32>
    %197 = vector.shape_cast %196 : vector<16xf32> to vector<16x1xf32>
    %198 = tpu.reciprocal %197 {approx = true} : vector<16x1xf32> -> vector<16x1xf32>
    %199 = vector.broadcast %198 : vector<16x1xf32> to vector<16x16xf32>
    %200 = arith.mulf %195, %199 : vector<16x16xf32>
    %201 = arith.truncf %200 : vector<16x16xf32> to vector<16x16xbf16>
    %cst_71 = arith.constant dense<0.000000e+00> : vector<16x128xf32>
    %202 = tpu.matmul %201, %188, %cst_71 {dimension_numbers = #tpu.dot_dimension_numbers<[1], [0], [0], [1], [0, 0, 1, 1], [], []>} : vector<16x16xbf16>, vector<16x128xbf16>, vector<16x128xf32> -> vector<16x128xf32>
    %203 = arith.addf %182, %202 : vector<16x128xf32>
    %204 = vector.extract_strided_slice %180 {offsets = [0, 128], sizes = [16, 128], strides = [1, 1]} : vector<16x896xf32> to vector<16x128xf32>
    %205 = arith.truncf %204 : vector<16x128xf32> to vector<16x128xbf16>
    %206 = vector.extract_strided_slice %180 {offsets = [0, 384], sizes = [16, 128], strides = [1, 1]} : vector<16x896xf32> to vector<16x128xf32>
    %207 = arith.truncf %206 : vector<16x128xf32> to vector<16x128xbf16>
    %208 = vector.extract_strided_slice %180 {offsets = [0, 640], sizes = [16, 128], strides = [1, 1]} : vector<16x896xf32> to vector<16x128xf32>
    %209 = arith.truncf %208 : vector<16x128xf32> to vector<16x128xbf16>
    %cst_72 = arith.constant dense<0.000000e+00> : vector<16x16xf32>
    %210 = tpu.matmul %205, %207, %cst_72 {dimension_numbers = #tpu.dot_dimension_numbers<[1], [1], [0], [0], [0, 0, 1, 0], [], []>} : vector<16x128xbf16>, vector<16x128xbf16>, vector<16x16xf32> -> vector<16x16xf32>
    %211 = arith.addf %210, %1 : vector<16x16xf32>
    %cst_73 = arith.constant dense<0xFF800000> : vector<16xf32>
    %212 = vector.multi_reduction <maximumf>, %211, %cst_73 [1] : vector<16x16xf32> to vector<16xf32>
    %213 = vector.shape_cast %212 : vector<16xf32> to vector<16x1xf32>
    %214 = vector.broadcast %213 : vector<16x1xf32> to vector<16x16xf32>
    %215 = arith.subf %211, %214 : vector<16x16xf32>
    %216 = math.exp %215 : vector<16x16xf32>
    %cst_74 = arith.constant dense<0.000000e+00> : vector<16xf32>
    %217 = vector.multi_reduction <add>, %216, %cst_74 [1] : vector<16x16xf32> to vector<16xf32>
    %218 = vector.shape_cast %217 : vector<16xf32> to vector<16x1xf32>
    %219 = tpu.reciprocal %218 {approx = true} : vector<16x1xf32> -> vector<16x1xf32>
    %220 = vector.broadcast %219 : vector<16x1xf32> to vector<16x16xf32>
    %221 = arith.mulf %216, %220 : vector<16x16xf32>
    %222 = arith.truncf %221 : vector<16x16xf32> to vector<16x16xbf16>
    %cst_75 = arith.constant dense<0.000000e+00> : vector<16x128xf32>
    %223 = tpu.matmul %222, %209, %cst_75 {dimension_numbers = #tpu.dot_dimension_numbers<[1], [0], [0], [1], [0, 0, 1, 1], [], []>} : vector<16x16xbf16>, vector<16x128xbf16>, vector<16x128xf32> -> vector<16x128xf32>
    %224 = arith.addf %203, %223 : vector<16x128xf32>
    %225 = vector.broadcast %2 : vector<16x1xf32> to vector<16x128xf32>
    %226 = arith.mulf %224, %225 : vector<16x128xf32>
    %227 = arith.addf %226, %181 : vector<16x128xf32>
    %cst_76 = arith.constant 0.000000e+00 : f32
    %228 = vector.broadcast %cst_76 : f32 to vector<16x128xf32>
    %229 = arith.maximumf %227, %228 : vector<16x128xf32>
    %c0_77 = arith.constant 0 : index
    %c0_78 = arith.constant 0 : index
    %230 = vector.load %arg3[%c0_77, %c0_78] : memref<2x16xf32, #tpu.memory_space<vmem>>, vector<2x16xf32>
    %231 = arith.truncf %230 : vector<2x16xf32> to vector<2x16xbf16>
    %232 = arith.truncf %229 : vector<16x128xf32> to vector<16x128xbf16>
    %cst_79 = arith.constant dense<0.000000e+00> : vector<2x128xf32>
    %233 = tpu.matmul %231, %232, %cst_79 {dimension_numbers = #tpu.dot_dimension_numbers<[1], [0], [0], [1], [0, 0, 1, 1], [], []>} : vector<2x16xbf16>, vector<16x128xbf16>, vector<2x128xf32> -> vector<2x128xf32>
    %234 = arith.truncf %233 : vector<2x128xf32> to vector<2x128xbf16>
    %c0_80 = arith.constant 0 : index
    %c0_81 = arith.constant 0 : index
    %235 = vector.load %arg8[%c0_80, %c0_81] : memref<128x128xbf16, #tpu.memory_space<vmem>>, vector<128x128xbf16>
    %cst_82 = arith.constant dense<0.000000e+00> : vector<2x128xf32>
    %236 = tpu.matmul %234, %235, %cst_82 {dimension_numbers = #tpu.dot_dimension_numbers<[1], [0], [0], [1], [0, 0, 1, 1], [], []>} : vector<2x128xbf16>, vector<128x128xbf16>, vector<2x128xf32> -> vector<2x128xf32>
    %c0_83 = arith.constant 0 : index
    %c0_84 = arith.constant 0 : index
    %237 = vector.load %arg9[%c0_83, %c0_84] : memref<1x128xf32, #tpu.memory_space<vmem>>, vector<1x128xf32>
    %238 = vector.broadcast %237 : vector<1x128xf32> to vector<2x128xf32>
    %239 = arith.addf %236, %238 : vector<2x128xf32>
    %c0_85 = arith.constant 0 : index
    %c0_86 = arith.constant 0 : index
    %240 = vector.load %arg10[%c0_85, %c0_86] : memref<2x128xf32, #tpu.memory_space<vmem>>, vector<2x128xf32>
    tpu.vector_store %arg10[%c0_85, %c0_86], %239 {strides = array<i32>} : memref<2x128xf32, #tpu.memory_space<vmem>>, vector<2x128xf32>,
    return
  }
}

</mosaic_0001>

<bundles_post_ra>
// kernel: tpu_custom_call.1
= control target key start
LH: loop header
LB: loop body
LE: loop exit
PB: predicated region body
PF: predicated region fallthrough
CT: control target
= control target key end

     0   :  { %15 = vsyncpa [#allocation3], 0  ;;  %s3537_s0 = inlined_call_operand.vmem [shape: f32[16,128], index: 0, kind: input, shape index: {}]   ;;  %s3538_s1 = inlined_call_operand.hbm [shape: f32[16,16], index: 1, kind: input, shape index: {}]   ;;  %s3539_s2 = inlined_call_operand.vmem [shape: f32[16,1], index: 2, kind: input, shape index: {}]   ;;  %s3540_s3 = inlined_call_operand.hbm [shape: f32[2,16], index: 3, kind: input, shape index: {}]   ;;  %s3541_s4 = inlined_call_operand.hbm [shape: bf16[3,128,896], index: 4, kind: input, shape index: {}]   ;;  %s3542_s5 = inlined_call_operand.hbm [shape: f32[3,1,896], index: 5, kind: input, shape index: {}]   ;;  %s3543_s6 = inlined_call_operand.vmem [shape: f32[2,1,128], index: 6, kind: input, shape index: {}]   ;;  %s3544_s7 = inlined_call_operand.vmem [shape: f32[2,1,128], index: 7, kind: input, shape index: {}]   ;;  %s3545_s8 = inlined_call_operand.hbm [shape: bf16[128,128], index: 8, kind: input, shape index: {}]   ;;  %s3546_s9 = inlined_call_operand.vmem [shape: f32[1,128], index: 9, kind: input, shape index: {}]   ;;  %s3547_s10 = inlined_call_operand.hbm [shape: f32[2,128], index: 10, kind: output, shape index: {}]  }
   0x1   :  { %16 = vsyncpa [#allocation6], 0 }
   0x2   :  { %17 = vsyncpa [#allocation9], 0  ;;  %s41_s15 = sshll.u32 %s3540_s3, 4  ;;  %s42_s15 = int_to_ptr.hbm [resolvable:$true] %s41_s15 }
   0x3   :  { %18 = vsyncpa [#allocation4], 0  ;;  %s3255_s16 = smov [#allocation5]   ;;  %s64_s20 = sshll.u32 %s3542_s5, 4  ;;  %s65_s20 = int_to_ptr.hbm [resolvable:$true] %s64_s20 }
   0x4   :  { %s43_s17 = sshll.u32 %s3255_s16, 4  ;;  %s3256_s21 = smov [#allocation8]   ;;  %s44_s17 = int_to_ptr.vmem [resolvable:$true] %s43_s17 }
   0x5   :  { %46 = dma.hbm_to_vmem [thread:$0]  %s42_s15, 32, %s44_s17, [#allocation6]  }
   0x6   :  { %s66_s22 = sshll.u32 %s3256_s21, 4  ;;  %s3257_s23 = smov 112   ;;  %s67_s22 = int_to_ptr.vmem [resolvable:$true] %s66_s22 }
   0x7   :  { %s3258_s24 = smov 7   ;;  %s25_s3 = sshll.u32 %s3538_s1, 4  ;;  %s26_s3 = int_to_ptr.hbm [resolvable:$true] %s25_s3 }
   0x8   :  { %72 = dma.hbm_to_vmem [thread:$0]  %s65_s20, 336, %s67_s22, [#allocation9], %s3257_s23, %s3257_s23, %s3258_s24  }
   0x9   :  { %s3259_s27 = smov [#allocation2]   ;;  %s51_s5 = sshll.u32 %s3541_s4, 4  ;;  %s52_s5 = int_to_ptr.hbm [resolvable:$true] %s51_s5 }
   0xa   :  { %s27_s28 = sshll.u32 %s3259_s27, 4  ;;  %s3260_s11 = smov 128   ;;  %s28_s28 = int_to_ptr.vmem [resolvable:$true] %s27_s28 }
   0xb   :  { %s3261_s12 = smov 8   ;;  %s3262_s13 = smov [#allocation7]  }
   0xc   :  { %33 = dma.hbm_to_vmem [thread:$0]  %s26_s3, 256, %s28_s28, [#allocation3], %s3260_s11, %s3260_s11, %s3261_s12  }
   0xd   :  { %s53_s14 = sshll.u32 %s3262_s13, 4  ;;  %s3263_s15 = smov 448   ;;  %s54_s14 = int_to_ptr.vmem [resolvable:$true] %s53_s14 }
   0xe   :  { %s3264_s16 = smov 28   ;;  %s81_s18 = sshll.u32 %s3545_s8, 4  ;;  %s82_s18 = int_to_ptr.hbm [resolvable:$true] %s81_s18 }
   0xf   :  { %59 = dma.hbm_to_vmem [thread:$0]  %s52_s5, 21504, %s54_s14, [#allocation6], %s3263_s15, %s3263_s15, %s3264_s16  }
  0x10   :  { %s3265_s19 = smov [#allocation10]   ;;  %s3266_s21 = smov 64  }
  0x11   :  { %s83_s20 = sshll.u32 %s3265_s19, 4  ;;  %s3267_s4 = smov 4   ;;  %s84_s20 = int_to_ptr.vmem [resolvable:$true] %s83_s20 }
  0x12   :  { %89 = dma.hbm_to_vmem [thread:$0]  %s82_s18, 1024, %s84_s20, [#allocation9], %s3266_s21, %s3266_s21, %s3267_s4  }
  0x13   :  { %3247 = dma.done.wait [#allocation3], 256  }
  0x14   :  { %3248 = vsyncadd [#allocation3], 4294967040 }
  0x15   :  { %3249 = dma.done.wait [#allocation6], 21536  }
  0x16   :  { %3250 = vsyncadd [#allocation6], 4294945760 }
  0x17   :  { %3251 = dma.done.wait [#allocation9], 1360  }
  0x18   :  { %3252 = vsyncadd [#allocation9], 4294965936  ;;  %v2340_v0 = vld [vmem:[#allocation7 + $0x190] sm:$0xf]  ;;  %v2900_v1 = vld [vmem:[#allocation7 + $0x1a8] sm:$0xf0] }
  0x19   :  { %v2312_v2 = vld [vmem:[#allocation7 + $0x158] sm:$0xf]  ;;  %v2341_v3 = vor.u32 %v2900_v1, %v2340_v0  ;;  %v2893_v4 = vld [vmem:[#allocation7 + $0x170] sm:$0xf0]  ;;  %v2332_v5 = vld [vmem:[#allocation7 + $0x188] sm:$0xf] }
  0x1a   :  { %v2899_v6 = vld [vmem:[#allocation7 + $0x1a0] sm:$0xf0]  ;;  %v2897_v8 = vld [vmem:[#allocation7 + $0x194] sm:$0xf]  ;;  %v2313_v9 = vor.u32 %v2893_v4, %v2312_v2  ;;  %v2342_v10 = vld [vmem:[#allocation7 + $0x1ac] sm:$0xf0] }
  0x1b   :  { %v2333_v7 = vor.u32 %v2899_v6, %v2332_v5  ;;  %516 = vmatpush.bf16.msra.mxu2 %v2341_v3  ;;  %v2304_v11 = vld [vmem:[#allocation7 + $0x150] sm:$0xf]  ;;  %v2892_v12 = vld [vmem:[#allocation7 + $0x168] sm:$0xf0]  ;;  %v2284_v13 = vld [vmem:[#allocation7 + $0x120] sm:$0xf]  ;;  %v2345_v15 = vor.u32 %v2897_v8, %v2342_v10 }
  0x1c   :  { %v2886_v14 = vld [vmem:[#allocation7 + $0x138] sm:$0xf0]  ;;  %v2305_v16 = vor.u32 %v2892_v12, %v2304_v11  ;;  %v2314_v18 = vld [vmem:[#allocation7 + $0x174] sm:$0xf0]  ;;  %v2885_v20 = vld [vmem:[#allocation7 + $0x130] sm:$0xf0] }
  0x1d   :  { %488 = vmatpush.bf16.msra.mxu0 %v2333_v7  ;;  %v2890_v17 = vld [vmem:[#allocation7 + $0x15c] sm:$0xf]  ;;  %v2276_v19 = vld [vmem:[#allocation7 + $0x118] sm:$0xf]  ;;  %530 = vmatpush.bf16.msra.mxu3 %v2345_v15  ;;  %v2285_v22 = vor.u32 %v2886_v14, %v2284_v13  ;;  %v2883_v23 = vld [vmem:[#allocation7 + $0x124] sm:$0xf] }
  0x1e   :  { %v2317_v21 = vor.u32 %v2890_v17, %v2314_v18  ;;  %v2286_v24 = vld [vmem:[#allocation7 + $0x13c] sm:$0xf0]  ;;  %v2256_v25 = vld [vmem:[#allocation7 + $0xe8] sm:$0xf]  ;;  %v2879_v26 = vld [vmem:[#allocation7 + $0x100] sm:$0xf0]  ;;  %v2277_v27 = vor.u32 %v2885_v20, %v2276_v19 }
  0x1f   :  { %517 = vmatpush.bf16.msra.mxu2 %v2313_v9  ;;  %v2248_v28 = vld [vmem:[#allocation7 + $0xe0] sm:$0xf]  ;;  %v2878_v29 = vld [vmem:[#allocation7 + $0xf8] sm:$0xf0]  ;;  %v2289_v30 = vor.u32 %v2883_v23, %v2286_v24  ;;  %v2896_v31 = vld [vmem:[#allocation7 + $0x18c] sm:$0xf]  ;;  %v2257_v33 = vor.u32 %v2879_v26, %v2256_v25 }
  0x20   :  { %v2334_v32 = vld [vmem:[#allocation7 + $0x1a4] sm:$0xf0]  ;;  %v2876_v34 = vld [vmem:[#allocation7 + $0xec] sm:$0xf]  ;;  %v2228_v37 = vld [vmem:[#allocation7 + $0xb0] sm:$0xf]  ;;  %v2249_v39 = vor.u32 %v2878_v29, %v2248_v28 }
  0x21   :  { %489 = vmatpush.bf16.msra.mxu0 %v2305_v16  ;;  %531 = vmatpush.bf16.msra.mxu3 %v2317_v21  ;;  %v2258_v35 = vld [vmem:[#allocation7 + $0x104] sm:$0xf0]  ;;  %v2337_v36 = vor.u32 %v2896_v31, %v2334_v32  ;;  %v2872_v38 = vld [vmem:[#allocation7 + $0xc8] sm:$0xf0]  ;;  %v2889_v40 = vld [vmem:[#allocation7 + $0x154] sm:$0xf] }
  0x22   :  { %v2220_v41 = vld [vmem:[#allocation7 + $0xa8] sm:$0xf]  ;;  %v2871_v42 = vld [vmem:[#allocation7 + $0xc0] sm:$0xf0]  ;;  %v2306_v43 = vld [vmem:[#allocation7 + $0x16c] sm:$0xf0]  ;;  %v2261_v44 = vor.u32 %v2876_v34, %v2258_v35  ;;  %v2229_v47 = vor.u32 %v2872_v38, %v2228_v37 }
  0x23   :  { %518 = vmatpush.bf16.msra.mxu2 %v2285_v22  ;;  %502 = vmatpush.bf16.msra.mxu1 %v2337_v36  ;;  %v2869_v45 = vld [vmem:[#allocation7 + $0xb4] sm:$0xf]  ;;  %v2309_v46 = vor.u32 %v2889_v40, %v2306_v43  ;;  %v2230_v48 = vld [vmem:[#allocation7 + $0xcc] sm:$0xf0]  ;;  %v2882_v49 = vld [vmem:[#allocation7 + $0x11c] sm:$0xf]  ;;  %v2221_v53 = vor.u32 %v2871_v42, %v2220_v41 }
  0x24   :  { %v2278_v50 = vld [vmem:[#allocation7 + $0x134] sm:$0xf0]  ;;  %v2865_v52 = vld [vmem:[#allocation7 + $0x90] sm:$0xf0]  ;;  %v2192_v54 = vld [vmem:[#allocation7 + $0x70] sm:$0xf]  ;;  %v2233_v57 = vor.u32 %v2869_v45, %v2230_v48 }
  0x25   :  { %490 = vmatpush.bf16.msra.mxu0 %v2277_v27  ;;  %532 = vmatpush.bf16.msra.mxu3 %v2289_v30  ;;  %v2200_v51 = vld [vmem:[#allocation7 + $0x78] sm:$0xf]  ;;  %v2864_v55 = vld [vmem:[#allocation7 + $0x88] sm:$0xf0]  ;;  %v2281_v56 = vor.u32 %v2882_v49, %v2278_v50  ;;  %v2875_v58 = vld [vmem:[#allocation7 + $0xe4] sm:$0xf] }
  0x26   :  { %v2250_v59 = vld [vmem:[#allocation7 + $0xfc] sm:$0xf0]  ;;  %v2201_v60 = vor.u32 %v2865_v52, %v2200_v51  ;;  %v2862_v61 = vld [vmem:[#allocation7 + $0x7c] sm:$0xf]  ;;  %v2202_v62 = vld [vmem:[#allocation7 + $0x94] sm:$0xf0]  ;;  %v2193_v1 = vor.u32 %v2864_v55, %v2192_v54 }
  0x27   :  { %519 = vmatpush.bf16.msra.mxu2 %v2257_v33  ;;  %503 = vmatpush.bf16.msra.mxu1 %v2309_v46  ;;  %v2172_v63 = vld [vmem:[#allocation7 + $0x40] sm:$0xf]  ;;  %v2858_v0 = vld [vmem:[#allocation7 + $0x58] sm:$0xf0]  ;;  %v2164_v2 = vld [vmem:[#allocation7 + $0x38] sm:$0xf]  ;;  %v2253_v5 = vor.u32 %v2875_v58, %v2250_v59  ;;  %v2205_v7 = vor.u32 %v2862_v61, %v2202_v62 }
  0x28   :  { %v2857_v3 = vld [vmem:[#allocation7 + $0x50] sm:$0xf0]  ;;  %v2855_v4 = vld [vmem:[#allocation7 + $0x44] sm:$0xf]  ;;  %v2868_v6 = vld [vmem:[#allocation7 + $0xac] sm:$0xf]  ;;  %v2173_v9 = vor.u32 %v2858_v0, %v2172_v63 }
  0x29   :  { %491 = vmatpush.bf16.msra.mxu0 %v2249_v39  ;;  %533 = vmatpush.bf16.msra.mxu3 %v2261_v44  ;;  %v2222_v8 = vld [vmem:[#allocation7 + $0xc4] sm:$0xf0]  ;;  %v2174_v10 = vld [vmem:[#allocation7 + $0x5c] sm:$0xf0]  ;;  %v2851_v12 = vld [vmem:[#allocation7 + $0x20] sm:$0xf0]  ;;  %v2165_v13 = vor.u32 %v2857_v3, %v2164_v2 }
  0x2a   :  { %v2144_v11 = vld [vmem:[#allocation7 + $0x8] sm:$0xf]  ;;  %v2136_v14 = vld [vmem:[#allocation7] sm:$0xf]  ;;  %v2850_v15 = vld [vmem:[#allocation7 + $0x18] sm:$0xf0]  ;;  %v2225_v16 = vor.u32 %v2868_v6, %v2222_v8  ;;  %v2177_v18 = vor.u32 %v2855_v4, %v2174_v10 }
  0x2b   :  { %520 = vmatpush.bf16.msra.mxu2 %v2229_v47  ;;  %504 = vmatpush.bf16.msra.mxu1 %v2281_v56  ;;  %v113_v17 = vld [vmem:[%s3537_s0] sm:$0xff]  ;;  %v2145_v21 = vor.u32 %v2851_v12, %v2144_v11  ;;  %v114_v22 = vld [vmem:[%s3537_s0 + $0x8] sm:$0xff]  ;;  %v2146_v24 = vld [vmem:[#allocation7 + $0x24] sm:$0xf0]  ;;  %v2137_v25 = vor.u32 %v2850_v15, %v2136_v14  ;;  %vm603_vm0 = vcmask 130048   ;;  %s3269_s13 = smov [#allocation11]  }
  0x2c   :  { %v2861_v19 = vld [vmem:[#allocation7 + $0x74] sm:$0xf]  ;;  %v2194_v20 = vld [vmem:[#allocation7 + $0x8c] sm:$0xf0]  ;;  %v2848_v23 = vld [vmem:[#allocation7 + $0xc] sm:$0xf]  ;;  %v3346_v27 = vpack.c.bf16 %v114_v22, %v113_v17 }
  0x2d   :  { %492 = vmatpush.bf16.msra.mxu0 %v2221_v53  ;;  %534 = vmatpush.bf16.msra.mxu3 %v2233_v57  ;;  %v2197_v26 = vor.u32 %v2861_v19, %v2194_v20  ;;  %v2149_v28 = vor.u32 %v2848_v23, %v2146_v24  ;;  %v2854_v29 = vld [vmem:[#allocation7 + $0x3c] sm:$0xf]  ;;  %v2166_v30 = vld [vmem:[#allocation7 + $0x54] sm:$0xf0]  ;;  %v2847_v32 = vld [vmem:[#allocation7 + $0x4] sm:$0xf] }
  0x2e   :  { %v2169_v31 = vor.u32 %v2854_v29, %v2166_v30  ;;  %v2138_v33 = vld [vmem:[#allocation7 + $0x1c] sm:$0xf0]  ;;  %v2901_v61 = vld [vmem:[#allocation7 + $0x1b0] sm:$0xf0]  ;;  %v2894_v0 = vld [vmem:[#allocation7 + $0x178] sm:$0xf0] }
  0x2f   :  { %521 = vmatpush.bf16.msra.mxu2 %v2201_v60  ;;  %505 = vmatpush.bf16.msra.mxu1 %v2253_v5  ;;  %v2141_v34 = vor.u32 %v2847_v32, %v2138_v33  ;;  %v3352_v37 = vld [vmem:[#allocation8] sm:$0xff]  ;;  %v2348_v60 = vld [vmem:[#allocation7 + $0x198] sm:$0xf]  ;;  %v2898_v2 = vld [vmem:[#allocation7 + $0x19c] sm:$0xf]  ;;  %s2120_s14 = sshll.u32 %s3269_s13, 4  ;;  %s2121_s14 = int_to_ptr.vmem [resolvable:$true] %s2120_s14 }
  0x30   :  { %v188_v39 = vperm.slane %v3352_v37, 2  ;;  %v189_v40 = vperm.slane %v3352_v37, 3  ;;  %v186_v44 = vperm.slane %v3352_v37, 0  ;;  %v187_v55 = vperm.slane %v3352_v37, 1  ;;  %v2320_v62 = vld [vmem:[#allocation7 + $0x160] sm:$0xf] }
  0x31   :  { %493 = vmatpush.bf16.msra.mxu0 %v2193_v1  ;;  %535 = vmatpush.bf16.msra.mxu3 %v2205_v7  ;;  %v2349_v63 = vor.u32 %v2901_v61, %v2348_v60  ;;  %v115_v1 = vld [vmem:[#allocation2] sm:$0xff]  ;;  %v2350_v3 = vld [vmem:[#allocation7 + $0x1b4] sm:$0xf0]  ;;  %v2321_v4 = vor.u32 %v2894_v0, %v2320_v62  ;;  %v2891_v6 = vld [vmem:[#allocation7 + $0x164] sm:$0xf]  ;;  %s2122_s17 = sshll.u32 %s3547_s10, 4  ;;  %s2123_s17 = int_to_ptr.hbm [resolvable:$true] %s2122_s17 }
  0x32   :  { %v2353_v5 = vor.u32 %v2898_v2, %v2350_v3  ;;  %v2322_v7 = vld [vmem:[#allocation7 + $0x17c] sm:$0xf0]  ;;  %v2887_v10 = vld [vmem:[#allocation7 + $0x140] sm:$0xf0]  ;;  %v2294_v14 = vld [vmem:[#allocation7 + $0x144] sm:$0xf0] }
  0x33   :  { %522 = vmatpush.bf16.msra.mxu2 %v2173_v9  ;;  %506 = vmatpush.bf16.msra.mxu1 %v2225_v16  ;;  %v2292_v9 = vld [vmem:[#allocation7 + $0x128] sm:$0xf]  ;;  %v2325_v12 = vor.u32 %v2891_v6, %v2322_v7  ;;  %v2264_v17 = vld [vmem:[#allocation7 + $0xf0] sm:$0xf]  ;;  %v3362_v20 = vld [vmem:[#allocation2 + $0x8] sm:$0xff] }
  0x34   :  { %v2293_v16 = vor.u32 %v2887_v10, %v2292_v9  ;;  %v2266_v22 = vld [vmem:[#allocation7 + $0x10c] sm:$0xf0]  ;;  %v2870_v30 = vld [vmem:[#allocation7 + $0xbc] sm:$0xf]  ;;  %v2895_v3 = vld [vmem:[#allocation7 + $0x180] sm:$0xf0] }
  0x35   :  { %494 = vmatpush.bf16.msra.mxu0 %v2165_v13  ;;  %536 = vmatpush.bf16.msra.mxu3 %v2177_v18  ;;  %v2884_v13 = vld [vmem:[#allocation7 + $0x12c] sm:$0xf]  ;;  %v2902_v0 = vld [vmem:[#allocation7 + $0x1b8] sm:$0xf0] }
  0x36   :  { %v2880_v18 = vld [vmem:[#allocation7 + $0x108] sm:$0xf0]  ;;  %v2297_v19 = vor.u32 %v2884_v13, %v2294_v14 }
  0x37   :  { %523 = vmatpush.bf16.msra.mxu2 %v2145_v21  ;;  %507 = vmatpush.bf16.msra.mxu1 %v2197_v26  ;;  %v2877_v21 = vld [vmem:[#allocation7 + $0xf4] sm:$0xf]  ;;  %v2265_v23 = vor.u32 %v2880_v18, %v2264_v17 }
  0x38   :  { %v2873_v26 = vld [vmem:[#allocation7 + $0xd0] sm:$0xf0]  ;;  %v2269_v29 = vor.u32 %v2877_v21, %v2266_v22 }
  0x39   :  { %495 = vmatpush.bf16.msra.mxu0 %v2137_v25  ;;  %537 = vmatpush.bf16.msra.mxu3 %v2149_v28  ;;  %v2236_v25 = vld [vmem:[#allocation7 + $0xb8] sm:$0xf] }
  0x3a   :  { %524 = vmatmul.bf16.vlgmr.msra.gmra.mxu2 %v3346_v27  ;;  %v2237_v33 = vor.u32 %v2873_v26, %v2236_v25  ;;  %v2272_v26 = vld [vmem:[#allocation7 + $0xf8] sm:$0xf] }
  0x3b   :  { %508 = vmatpush.bf16.msra.mxu1 %v2169_v31  ;;  %v2238_v31 = vld [vmem:[#allocation7 + $0xd4] sm:$0xf0] }
  0x3c   :  { %496 = vmatmul.bf16.vlgmr.msra.gmra.mxu0 %v3346_v27  ;;  %538 = vmatmul.bf16.vlgmr.msra.gmra.mxu3 %v3346_v27 }
  0x3d   :  { %544 = vmatpush.bf16.msrb.mxu0 %v2349_v63  ;;  %v2356_v63 = vld [vmem:[#allocation7 + $0x1a0] sm:$0xf] }
  0x3e   :  { %v2357_v2 = vor.u32 %v2902_v0, %v2356_v63 }
  0x3f   :  { %509 = vmatpush.bf16.msra.mxu1 %v2141_v34  ;;  %v2208_v34 = vld [vmem:[#allocation7 + $0x80] sm:$0xf] }
  0x40   :  { %572 = vmatpush.bf16.msrb.mxu2 %v2357_v2 }
  0x41   :  { %545 = vmatpush.bf16.msrb.mxu0 %v2321_v4 }
  0x42   :  { %510 = vmatmul.bf16.vlgmr.msra.gmra.mxu1 %v3346_v27 }
  0x43   :  { %558 = vmatpush.bf16.msrb.mxu1 %v2353_v5 }
  0x45   :  { %546 = vmatpush.bf16.msrb.mxu0 %v2293_v16 }
  0x47   :  { %559 = vmatpush.bf16.msrb.mxu1 %v2325_v12 }
  0x49   :  { %547 = vmatpush.bf16.msrb.mxu0 %v2265_v23  ;;  %v2300_v23 = vld [vmem:[#allocation7 + $0x130] sm:$0xf] }
  0x4b   :  { %560 = vmatpush.bf16.msrb.mxu1 %v2297_v19 }
  0x4d   :  { %548 = vmatpush.bf16.msrb.mxu0 %v2237_v33 }
  0x4f   :  { %561 = vmatpush.bf16.msrb.mxu1 %v2269_v29 }
  0xb9   :  { %v497_v36 = vpop.f32.mrf.mxu0 }
  0xba   :  { %v498_v50 = vadd.f32 %v497_v36, %v186_v44  ;;  %v2241_v36 = vor.u32 %v2870_v30, %v2238_v31  ;;  %v2244_v31 = vld [vmem:[#allocation7 + $0xc0] sm:$0xf] }
  0xbc   :  { %562 = vmatpush.bf16.msrb.mxu1 %v2241_v36  ;;  %v2867_v36 = vld [vmem:[#allocation7 + $0xa0] sm:$0xf0] }
  0xbd   :  { %v525_v35 = vpop.f32.mrf.mxu2 }
  0xbe   :  { %v526_v42 = vadd.f32 %v525_v35, %v188_v39  ;;  %v2866_v35 = vld [vmem:[#allocation7 + $0x98] sm:$0xf0] }
  0xbf   :  { %v539_v38 = vpop.f32.mrf.mxu3  ;;  %v511_v53 = vpop.f32.mrf.mxu1 }
  0xc0   :  { %v540_v45 = vadd.f32 %v539_v38, %v189_v40  ;;  %v512_v57 = vadd.f32 %v511_v53, %v187_v55  ;;  %v2209_v38 = vor.u32 %v2866_v35, %v2208_v34  ;;  %v190_v34 = vperm.slane %v3352_v37, 4  ;;  %v2216_v35 = vld [vmem:[#allocation7 + $0x88] sm:$0xf] }
  0xc1   :  { %v499_v46 = vpop.f32.mrf.mxu0 }
  0xc2   :  { %v500_v51 = vadd.f32 %v499_v46, %v186_v44  ;;  %549 = vmatpush.bf16.msrb.mxu0 %v2209_v38 }
  0xc4   :  { %v586_v54 = vpack.c.bf16 %v500_v51, %v498_v50  ;;  %v2863_v50 = vld [vmem:[#allocation7 + $0x84] sm:$0xf] }
  0xc5   :  { %v527_v41 = vpop.f32.mrf.mxu2 }
  0xc6   :  { %v528_v43 = vadd.f32 %v527_v41, %v188_v39  ;;  %v2859_v41 = vld [vmem:[#allocation7 + $0x60] sm:$0xf0] }
  0xc7   :  { %v541_v48 = vpop.f32.mrf.mxu3  ;;  %v513_v56 = vpop.f32.mrf.mxu1 }
  0xc8   :  { %v587_v47 = vpack.c.bf16 %v528_v43, %v526_v42  ;;  %v542_v49 = vadd.f32 %v541_v48, %v189_v40  ;;  %v514_v58 = vadd.f32 %v513_v56, %v187_v55  ;;  %v2180_v40 = vld [vmem:[#allocation7 + $0x48] sm:$0xf]  ;;  %v2152_v48 = vld [vmem:[#allocation7 + $0x10] sm:$0xf] }
  0xc9   :  { %v2181_v44 = vor.u32 %v2859_v41, %v2180_v40  ;;  %v2182_v55 = vld [vmem:[#allocation7 + $0x64] sm:$0xf0] }
  0xca   :  { %596 = vmatpush.bf16.xpose.msrb.mxu3 %v587_v47  ;;  %v628_v52 = vpack.c.bf16 %v542_v49, %v540_v45  ;;  %v627_v59 = vpack.c.bf16 %v514_v58, %v512_v57  ;;  %v2852_v49 = vld [vmem:[#allocation7 + $0x28] sm:$0xf0]  ;;  %v2849_v57 = vld [vmem:[#allocation7 + $0x14] sm:$0xf]  ;;  %v2154_v58 = vld [vmem:[#allocation7 + $0x2c] sm:$0xf0] }
  0xcb   :  { %550 = vmatpush.bf16.msrb.mxu0 %v2181_v44  ;;  %v2153_v51 = vor.u32 %v2852_v49, %v2152_v48  ;;  %v2860_v44 = vld [vmem:[#allocation7 + $0x68] sm:$0xf0]  ;;  %v2160_v48 = vld [vmem:[#allocation7 + $0x18] sm:$0xf]  ;;  %v2853_v49 = vld [vmem:[#allocation7 + $0x30] sm:$0xf0] }
  0xcf   :  { %551 = vmatpush.bf16.msrb.mxu0 %v2153_v51 }
  0xd1   :  { %597 = vmatmul.bf16.vlgmr.msrb.gmra.mxu3 %v586_v54  ;;  %v2856_v54 = vld [vmem:[#allocation7 + $0x4c] sm:$0xf] }
  0xd2   :  { %637 = vmatpush.bf16.xpose.msra.mxu3 %v628_v52  ;;  %v2210_v52 = vld [vmem:[#allocation7 + $0x9c] sm:$0xf0]  ;;  %v2185_v56 = vor.u32 %v2856_v54, %v2182_v55  ;;  %552 = vmatmul.bf16.vlgmr.msrb.gmra.mxu0 %v3346_v27 }
  0xd3   :  { %v2213_v53 = vor.u32 %v2863_v50, %v2210_v52  ;;  %v2161_v50 = vor.u32 %v2853_v49, %v2160_v48  ;;  %v2502_v48 = vld [vmem:[#allocation7 + $0x2d8] sm:$0xf]  ;;  %v2941_v49 = vld [vmem:[#allocation7 + $0x2f0] sm:$0xf0] }
  0xd5   :  { %563 = vmatpush.bf16.msrb.mxu1 %v2213_v53 }
  0xd9   :  { %564 = vmatpush.bf16.msrb.mxu1 %v2185_v56  ;;  %v118_v56 = vld [vmem:[%s3539_s2 + $0x8] sm:$0xff] }
  0xe1   :  { %638 = vmatmul.bf16.vlgmr.msra.gmra.mxu3 %v627_v59  ;;  %v2157_v59 = vor.u32 %v2849_v57, %v2154_v58  ;;  %v117_v57 = vld [vmem:[%s3539_s2] sm:$0xff]  ;;  %v3268_v58 = vmov 0  }
  0xe2   :  { %3039 = vset.pattern.permute.xlu0 %v3268_v58  ;;  %3038 = vset.pattern.permute.xlu2 %v3268_v58  ;;  %v2934_v58 = vld [vmem:[#allocation7 + $0x2b8] sm:$0xf0] }
  0xe3   :  { %565 = vmatpush.bf16.msrb.mxu1 %v2157_v59 }
  0xe6   :  { %566 = vmatmul.bf16.vlgmr.msrb.gmra.mxu1 %v3346_v27 }
 0x14f   :  { %v553_v30 = vpop.f32.mrf.mxu0 }
 0x150   :  { %v554_v38 = vadd.f32 %v553_v30, %v190_v34  ;;  %v2955_v30 = vld [vmem:[#allocation7 + $0x360] sm:$0xf0] }
 0x154   :  { %v598_v8 = vpop.f32.mrf.mxu3 }
 0x155   :  { %v3358_v11 = vadd.f32 %v598_v8, %v115_v1 }
 0x157   :  { %v604_v15 = vsel %vm603_vm0, %v3358_v11, -inf  ;;  %v555_v40 = vpop.f32.mrf.mxu0 }
 0x158   :  { %605 = vmax.xlane.f32.xlu0 %v604_v15  ;;  %v556_v41 = vadd.f32 %v555_v40, %v190_v34  ;;  %v2566_v34 = vld [vmem:[#allocation7 + $0x350] sm:$0xf]  ;;  %v2948_v40 = vld [vmem:[#allocation7 + $0x328] sm:$0xf0] }
 0x15c   :  { %v600_v24 = vpop.f32.mrf.mxu3 }
 0x15d   :  { %v601_v28 = vadd.f32 %v600_v24, %v3362_v20  ;;  %v2888_v24 = vld [vmem:[#allocation7 + $0x148] sm:$0xf0] }
 0x15e   :  { %v2301_v25 = vor.u32 %v2888_v24, %v2300_v23 }
 0x15f   :  { %v607_v32 = vsel %vm603_vm0, %v601_v28, -inf }
 0x160   :  { %608 = vmax.xlane.f32.xlu0 %v607_v32  ;;  %v2874_v32 = vld [vmem:[#allocation7 + $0xd8] sm:$0xf0] }
 0x161   :  { %v2245_v33 = vor.u32 %v2874_v32, %v2244_v31  ;;  %v2952_v31 = vld [vmem:[#allocation7 + $0x34c] sm:$0xf] }
 0x164   :  { %v639_v39 = vpop.f32.mrf.mxu3 }
 0x165   :  { %v640_v42 = vadd.f32 %v639_v39, %v115_v1  ;;  %v2328_v1 = vld [vmem:[#allocation7 + $0x168] sm:$0xf]  ;;  %v2217_v39 = vor.u32 %v2867_v36, %v2216_v35  ;;  %v2956_v35 = vld [vmem:[#allocation7 + $0x368] sm:$0xf0] }
 0x166   :  { %v2329_v5 = vor.u32 %v2895_v3, %v2328_v1 }
 0x167   :  { %v644_v43 = vsel %vm603_vm0, %v640_v42, -inf }
 0x168   :  { %645 = vmax.xlane.f32.xlu1 %v644_v43  ;;  %573 = vmatpush.bf16.msrb.mxu2 %v2329_v5  ;;  %v2188_v43 = vld [vmem:[#allocation7 + $0x50] sm:$0xf] }
 0x16c   :  { %v641_v45 = vpop.f32.mrf.mxu3  ;;  %574 = vmatpush.bf16.msrb.mxu2 %v2301_v25 }
 0x16d   :  { %v642_v46 = vadd.f32 %v641_v45, %v3362_v20  ;;  %v588_v45 = vpack.c.bf16 %v556_v41, %v554_v38  ;;  %v2567_v38 = vor.u32 %v2956_v35, %v2566_v34  ;;  %v2945_v41 = vld [vmem:[#allocation7 + $0x314] sm:$0xf]  ;;  %v2910_v35 = vld [vmem:[#allocation7 + $0x1fc] sm:$0xf] }
 0x16e   :  { %v2913_v34 = vld [vmem:[#allocation7 + $0x210] sm:$0xf0] }
 0x16f   :  { %v647_v47 = vsel %vm603_vm0, %v642_v46, -inf  ;;  %694 = vmatpush.bf16.msra.mxu1 %v588_v45  ;;  %v2949_v45 = vld [vmem:[#allocation7 + $0x330] sm:$0xf0] }
 0x170   :  { %648 = vmax.xlane.f32.xlu1 %v647_v47  ;;  %v191_v47 = vperm.slane %v3352_v37, 5 }
 0x1cb   :  { %v606_v60 = vpop.xlane.xlu0 %605 }
 0x1cc   :  { %v610_v61 = vsub.f32 %v3358_v11, %v606_v60 }
 0x1ce   :  { %v612_v62 = vmul.f32 1.442695, %v610_v61 }
 0x1d0   :  { %3045 = vpow2.f32 %v612_v62 }
 0x1d3   :  { %v609_v4 = vpop.xlane.xlu0 %608 }
 0x1d4   :  { %v611_v6 = vsub.f32 %v601_v28, %v609_v4  ;;  %v2881_v28 = vld [vmem:[#allocation7 + $0x110] sm:$0xf0] }
 0x1d5   :  { %v2273_v29 = vor.u32 %v2881_v28, %v2272_v26 }
 0x1d6   :  { %v3372_v7 = vpop.eup %3045  ;;  %v614_v8 = vmul.f32 1.442695, %v611_v6 }
 0x1d7   :  { %v616_v9 = vsel %vm603_vm0, %v3372_v7, 0.0  ;;  %575 = vmatpush.bf16.msrb.mxu2 %v2273_v29  ;;  %v2558_v29 = vld [vmem:[#allocation7 + $0x348] sm:$0xf] }
 0x1d8   :  { %3047 = vpow2.f32 %v614_v8  ;;  %617 = vadd.xlane.f32.xlu2 %v616_v9  ;;  %v2559_v32 = vor.u32 %v2955_v30, %v2558_v29  ;;  %v2939_v30 = vld [vmem:[#allocation7 + $0x2e4] sm:$0xf] }
 0x1db   :  { %v646_v10 = vpop.xlane.xlu1 %645  ;;  %576 = vmatpush.bf16.msrb.mxu2 %v2245_v33  ;;  %v2560_v33 = vld [vmem:[#allocation7 + $0x364] sm:$0xf0] }
 0x1dc   :  { %v650_v11 = vsub.f32 %v640_v42, %v646_v10  ;;  %v567_v42 = vpop.f32.mrf.mxu1  ;;  %v2563_v36 = vor.u32 %v2952_v31, %v2560_v33  ;;  %v2512_v31 = vld [vmem:[#allocation7 + $0x2fc] sm:$0xf0]  ;;  %v2390_v33 = vld [vmem:[#allocation7 + $0x1f8] sm:$0xf] }
 0x1dd   :  { %v568_v51 = vadd.f32 %v567_v42, %v191_v47 }
 0x1de   :  { %v3376_v12 = vpop.eup %3047  ;;  %v652_v13 = vmul.f32 1.442695, %v650_v11  ;;  %1160 = vmatpush.bf16.msrb.mxu3 %v2563_v36  ;;  %v2391_v36 = vor.u32 %v2913_v34, %v2390_v33  ;;  %v2526_v33 = vld [vmem:[#allocation7 + $0x2f0] sm:$0xf] }
 0x1df   :  { %v619_v14 = vsel %vm603_vm0, %v3376_v12, 0.0  ;;  %577 = vmatpush.bf16.msrb.mxu2 %v2217_v39  ;;  %v2530_v39 = vld [vmem:[#allocation7 + $0x310] sm:$0xf] }
 0x1e0   :  { %3049 = vpow2.f32 %v652_v13  ;;  %620 = vadd.xlane.f32.xlu2 %v619_v14  ;;  %v2531_v42 = vor.u32 %v2948_v40, %v2530_v39  ;;  %v2398_v39 = vld [vmem:[#allocation7 + $0x200] sm:$0xf]  ;;  %v2914_v40 = vld [vmem:[#allocation7 + $0x218] sm:$0xf0] }
 0x1e3   :  { %v649_v15 = vpop.xlane.xlu1 %648 }
 0x1e4   :  { %v651_v16 = vsub.f32 %v642_v46, %v649_v15  ;;  %v2189_v46 = vor.u32 %v2860_v44, %v2188_v43  ;;  %v569_v52 = vpop.f32.mrf.mxu1  ;;  %v2532_v43 = vld [vmem:[#allocation7 + $0x32c] sm:$0xf0]  ;;  %v2538_v44 = vld [vmem:[#allocation7 + $0x318] sm:$0xf] }
 0x1e5   :  { %v570_v53 = vadd.f32 %v569_v52, %v191_v47  ;;  %v2539_v47 = vor.u32 %v2949_v45, %v2538_v44  ;;  %v2504_v52 = vld [vmem:[#allocation7 + $0x2f4] sm:$0xf0]  ;;  %v2484_v44 = vld [vmem:[#allocation7 + $0x2c4] sm:$0xf0] }
 0x1e6   :  { %v3380_v17 = vpop.eup %3049  ;;  %v654_v18 = vmul.f32 1.442695, %v651_v16  ;;  %578 = vmatpush.bf16.msrb.mxu2 %v2189_v46  ;;  %v2535_v46 = vor.u32 %v2945_v41, %v2532_v43  ;;  %v2932_v43 = vld [vmem:[#allocation7 + $0x2ac] sm:$0xf] }
 0x1e7   :  { %v656_v19 = vsel %vm603_vm0, %v3380_v17, 0.0  ;;  %v629_v54 = vpack.c.bf16 %v570_v53, %v568_v51  ;;  %v2503_v51 = vor.u32 %v2941_v49, %v2502_v48  ;;  %v2510_v53 = vld [vmem:[#allocation7 + $0x2e0] sm:$0xf]  ;;  %v2487_v45 = vor.u32 %v2932_v43, %v2484_v44  ;;  %v2906_v48 = vld [vmem:[#allocation7 + $0x1d8] sm:$0xf0] }
 0x1e8   :  { %3051 = vpow2.f32 %v654_v18  ;;  %657 = vadd.xlane.f32.xlu0 %v656_v19  ;;  %1161 = vmatpush.bf16.msrb.mxu3 %v2535_v46  ;;  %v2903_v49 = vld [vmem:[#allocation7 + $0x1c4] sm:$0xf]  ;;  %v2936_v44 = vld [vmem:[#allocation7 + $0x2c8] sm:$0xf0] }
 0x1e9   :  { %677 = vmatpush.bf16.msra.mxu0 %v629_v54  ;;  %v2942_v54 = vld [vmem:[#allocation7 + $0x2f8] sm:$0xf0] }
 0x1ea   :  { %579 = vmatpush.bf16.msrb.mxu2 %v2161_v50  ;;  %v2938_v50 = vld [vmem:[#allocation7 + $0x2dc] sm:$0xf] }
 0x1ed   :  { %580 = vmatmul.bf16.vlgmr.msrb.gmra.mxu2 %v3346_v27  ;;  %1174 = vmatpush.bf16.msrb.mxu0 %v2567_v38  ;;  %v2392_v38 = vld [vmem:[#allocation7 + $0x214] sm:$0xf0] }
 0x1ee   :  { %v3384_v21 = vpop.eup %3051  ;;  %1146 = vmatpush.bf16.msra.mxu2 %v2559_v32  ;;  %v2515_v32 = vor.u32 %v2939_v30, %v2512_v31  ;;  %v2395_v41 = vor.u32 %v2910_v35, %v2392_v38 }
 0x1ef   :  { %v659_v22 = vsel %vm603_vm0, %v3384_v21, 0.0 }
 0x1f0   :  { %660 = vadd.xlane.f32.xlu1 %v659_v22 }
 0x1f1   :  { %1175 = vmatpush.bf16.msrb.mxu0 %v2539_v47  ;;  %v2362_v47 = vld [vmem:[#allocation7 + $0x1c0] sm:$0xf] }
 0x1f2   :  { %1147 = vmatpush.bf16.msra.mxu2 %v2531_v42  ;;  %v2399_v42 = vor.u32 %v2914_v40, %v2398_v39  ;;  %v2904_v40 = vld [vmem:[#allocation7 + $0x1cc] sm:$0xf] }
 0x1f6   :  { %1148 = vmatpush.bf16.msra.mxu2 %v2503_v51  ;;  %v2364_v51 = vld [vmem:[#allocation7 + $0x1dc] sm:$0xf0] }
 0x1f8   :  { %703 = vperm.xlu2 %3038, %v117_v57   ;;  %v2474_v57 = vld [vmem:[#allocation7 + $0x2a0] sm:$0xf] }
 0x1fc   :  { %708 = vperm.xlu0 %3039, %v118_v56   ;;  %v2511_v56 = vor.u32 %v2942_v54, %v2510_v53  ;;  %v2367_v53 = vor.u32 %v2903_v49, %v2364_v51  ;;  %v2907_v54 = vld [vmem:[#allocation7 + $0x1e0] sm:$0xf0]  ;;  %v2937_v51 = vld [vmem:[#allocation7 + $0x2d0] sm:$0xf0] }
 0x1fe   :  { %1176 = vmatpush.bf16.msrb.mxu0 %v2511_v56  ;;  %v2456_v56 = vld [vmem:[#allocation7 + $0x28c] sm:$0xf0] }
 0x24b   :  { %v618_v55 = vpop.xlane.xlu2 %617 }
 0x24c   :  { %3053 = vrcp.f32 %v618_v55  ;;  %v2507_v55 = vor.u32 %v2938_v50, %v2504_v52  ;;  %v2363_v50 = vor.u32 %v2906_v48, %v2362_v47  ;;  %v2370_v52 = vld [vmem:[#allocation7 + $0x1c8] sm:$0xf]  ;;  %v2492_v47 = vld [vmem:[#allocation7 + $0x2cc] sm:$0xf0] }
 0x24e   :  { %1162 = vmatpush.bf16.msrb.mxu3 %v2507_v55  ;;  %v2925_v55 = vld [vmem:[#allocation7 + $0x274] sm:$0xf] }
 0x252   :  { %v3054_v60 = vpop.eup %3053 }
 0x253   :  { %v621_v59 = vpop.xlane.xlu2 %620  ;;  %v624_v61 = vmul.f32 %v3054_v60, %v3372_v7  ;;  %v192_v7 = vperm.slane %v3352_v37, 6  ;;  %v2475_v60 = vor.u32 %v2934_v58, %v2474_v57  ;;  %v2371_v57 = vor.u32 %v2907_v54, %v2370_v52 }
 0x254   :  { %3055 = vrcp.f32 %v621_v59  ;;  %v2931_v59 = vld [vmem:[#allocation7 + $0x2a4] sm:$0xf]  ;;  %v2459_v58 = vor.u32 %v2925_v55, %v2456_v56 }
 0x255   :  { %1149 = vmatpush.bf16.msra.mxu2 %v2475_v60  ;;  %v2957_v60 = vld [vmem:[#allocation7 + $0x370] sm:$0xf0] }
 0x25a   :  { %v3056_v27 = vpop.eup %3055 }
 0x25b   :  { %v625_v62 = vmul.f32 %v3056_v27, %v3376_v12  ;;  %v658_v0 = vpop.xlane.xlu0 %657  ;;  %v3404_v11 = vpop.permute.xlu2 %703  ;;  %v2476_v27 = vld [vmem:[#allocation7 + $0x2bc] sm:$0xf0] }
 0x25c   :  { %3057 = vrcp.f32 %v658_v0 }
 0x25d   :  { %v626_v63 = vpack.c.bf16 %v625_v62, %v624_v61  ;;  %v2482_v61 = vld [vmem:[#allocation7 + $0x2a8] sm:$0xf]  ;;  %v2935_v62 = vld [vmem:[#allocation7 + $0x2c0] sm:$0xf0] }
 0x25e   :  { %v2483_v0 = vor.u32 %v2935_v62, %v2482_v61  ;;  %v2576_v62 = vld [vmem:[#allocation7 + $0x374] sm:$0xf0] }
 0x25f   :  { %2359 = vmatmul.msk.bf16.vlgmr.msra.gmra.mxu1 %vm603_vm0, %v626_v63  ;;  %v2479_v63 = vor.u32 %v2931_v59, %v2476_v27  ;;  %v2574_v59 = vld [vmem:[#allocation7 + $0x358] sm:$0xf]  ;;  %v2954_v27 = vld [vmem:[#allocation7 + $0x35c] sm:$0xf] }
 0x260   :  { %1177 = vmatpush.bf16.msrb.mxu0 %v2483_v0  ;;  %v2575_v61 = vor.u32 %v2957_v60, %v2574_v59  ;;  %v2958_v0 = vld [vmem:[#allocation7 + $0x378] sm:$0xf0] }
 0x261   :  { %1163 = vmatpush.bf16.msrb.mxu3 %v2479_v63  ;;  %v2582_v63 = vld [vmem:[#allocation7 + $0x360] sm:$0xf]  ;;  %v2926_v59 = vld [vmem:[#allocation7 + $0x27c] sm:$0xf] }
 0x262   :  { %v3058_v2 = vpop.eup %3057 }
 0x263   :  { %v661_v1 = vpop.xlane.xlu1 %660  ;;  %v664_v4 = vmul.f32 %v3058_v2, %v3380_v17  ;;  %v2568_v2 = vld [vmem:[#allocation7 + $0x36c] sm:$0xf0] }
 0x264   :  { %3059 = vrcp.f32 %v661_v1  ;;  %v2953_v1 = vld [vmem:[#allocation7 + $0x354] sm:$0xf] }
 0x26a   :  { %v3060_v3 = vpop.eup %3059 }
 0x26b   :  { %v665_v5 = vmul.f32 %v3060_v3, %v3384_v21  ;;  %v2571_v3 = vor.u32 %v2953_v1, %v2568_v2  ;;  %v2579_v1 = vor.u32 %v2954_v27, %v2576_v62  ;;  %v2583_v2 = vor.u32 %v2958_v0, %v2582_v63  ;;  %v2470_v62 = vld [vmem:[#allocation7 + $0x280] sm:$0xf]  ;;  %v2930_v63 = vld [vmem:[#allocation7 + $0x298] sm:$0xf0] }
 0x26d   :  { %v666_v6 = vpack.c.bf16 %v665_v5, %v664_v4  ;;  %v2446_v4 = vld [vmem:[#allocation7 + $0x268] sm:$0xf]  ;;  %v2927_v5 = vld [vmem:[#allocation7 + $0x280] sm:$0xf0]  ;;  %1188 = vmatpush.bf16.msrb.mxu1 %v2571_v3  ;;  %v2918_v3 = vld [vmem:[#allocation7 + $0x23c] sm:$0xf] }
 0x26e   :  { %v3409_v17 = vpop.permute.xlu0 %708 }
 0x26f   :  { %2358 = vmatmul.msk.bf16.vlgmr.msra.gmra.mxu0 %vm603_vm0, %v666_v6  ;;  %v2924_v6 = vld [vmem:[#allocation7 + $0x26c] sm:$0xf] }
 0x270   :  { %v581_v8 = vpop.f32.mrf.mxu2 }
 0x271   :  { %v582_v12 = vadd.f32 %v581_v8, %v192_v7  ;;  %v2448_v8 = vld [vmem:[#allocation7 + $0x284] sm:$0xf0] }
 0x278   :  { %v583_v16 = vpop.f32.mrf.mxu2 }
 0x279   :  { %v584_v37 = vadd.f32 %v583_v16, %v192_v7  ;;  %v2447_v7 = vor.u32 %v2927_v5, %v2446_v4  ;;  %v2428_v4 = vld [vmem:[#allocation7 + $0x254] sm:$0xf0]  ;;  %v2546_v5 = vld [vmem:[#allocation7 + $0x320] sm:$0xf] }
 0x27b   :  { %1150 = vmatpush.bf16.msra.mxu2 %v2447_v7  ;;  %v2950_v7 = vld [vmem:[#allocation7 + $0x338] sm:$0xf0] }
 0x2dc   :  { %v696_v9 = vpop.f32.mrf.mxu1 }
 0x2e4   :  { %v698_v19 = vpop.f32.mrf.mxu1 }
 0x2ec   :  { %v679_v10 = vpop.f32.mrf.mxu0 }
 0x2ed   :  { %v697_v13 = vadd.f32 %v696_v9, %v679_v10  ;;  %v2454_v9 = vld [vmem:[#allocation7 + $0x270] sm:$0xf]  ;;  %v2928_v10 = vld [vmem:[#allocation7 + $0x288] sm:$0xf0] }
 0x2ef   :  { %v711_v14 = vmul.f32 %v3404_v11, %v697_v13  ;;  %v2455_v13 = vor.u32 %v2928_v10, %v2454_v9  ;;  %v2548_v9 = vld [vmem:[#allocation7 + $0x33c] sm:$0xf0]  ;;  %v2547_v10 = vor.u32 %v2950_v7, %v2546_v5  ;;  %v2442_v7 = vld [vmem:[#allocation7 + $0x248] sm:$0xf] }
 0x2f1   :  { %v713_v15 = vadd.f32 %v711_v14, %v582_v12  ;;  %v2451_v12 = vor.u32 %v2924_v6, %v2448_v8  ;;  %v2946_v14 = vld [vmem:[#allocation7 + $0x31c] sm:$0xf]  ;;  %1178 = vmatpush.bf16.msrb.mxu0 %v2455_v13  ;;  %v2431_v6 = vor.u32 %v2918_v3, %v2428_v4  ;;  %v2947_v8 = vld [vmem:[#allocation7 + $0x324] sm:$0xf]  ;;  %v2554_v13 = vld [vmem:[#allocation7 + $0x328] sm:$0xf] }
 0x2f2   :  { %v2922_v3 = vld [vmem:[#allocation7 + $0x258] sm:$0xf0]  ;;  %v2919_v4 = vld [vmem:[#allocation7 + $0x244] sm:$0xf] }
 0x2f3   :  { %v3407_v18 = vmax.f32 %v713_v15, 0.0  ;;  %v2540_v15 = vld [vmem:[#allocation7 + $0x334] sm:$0xf0]  ;;  %1164 = vmatpush.bf16.msrb.mxu3 %v2451_v12  ;;  %v2551_v12 = vor.u32 %v2947_v8, %v2548_v9  ;;  %v2923_v9 = vld [vmem:[#allocation7 + $0x260] sm:$0xf0] }
 0x2f4   :  { %v681_v21 = vpop.f32.mrf.mxu0  ;;  %v2543_v16 = vor.u32 %v2946_v14, %v2540_v15  ;;  %v2951_v14 = vld [vmem:[#allocation7 + $0x340] sm:$0xf0] }
 0x2f5   :  { %v699_v22 = vadd.f32 %v698_v19, %v681_v21  ;;  %719 = vadd.xlane.f32.xlu1 %v3407_v18  ;;  %v725_v28 = vmul.f32 %v3407_v18, %v3407_v18  ;;  %v2418_v19 = vld [vmem:[#allocation7 + $0x230] sm:$0xf]  ;;  %v2920_v21 = vld [vmem:[#allocation7 + $0x248] sm:$0xf0] }
 0x2f6   :  { %1189 = vmatpush.bf16.msrb.mxu1 %v2543_v16  ;;  %v2555_v16 = vor.u32 %v2951_v14, %v2554_v13  ;;  %v2443_v14 = vor.u32 %v2923_v9, %v2442_v7 }
 0x2f7   :  { %v712_v23 = vmul.f32 %v3409_v17, %v699_v22  ;;  %v2917_v22 = vld [vmem:[#allocation7 + $0x234] sm:$0xf] }
 0x2f9   :  { %v714_v24 = vadd.f32 %v712_v23, %v584_v37  ;;  %v2419_v37 = vor.u32 %v2920_v21, %v2418_v19  ;;  %v2420_v23 = vld [vmem:[#allocation7 + $0x24c] sm:$0xf0]  ;;  %v2911_v21 = vld [vmem:[#allocation7 + $0x204] sm:$0xf] }
 0x2fa   :  { %1190 = vmatpush.bf16.msrb.mxu1 %v2515_v32  ;;  %v2520_v32 = vld [vmem:[#allocation7 + $0x304] sm:$0xf0] }
 0x2fb   :  { %v3413_v25 = vmax.f32 %v714_v24, 0.0  ;;  %v2426_v24 = vld [vmem:[#allocation7 + $0x238] sm:$0xf]  ;;  %1151 = vmatpush.bf16.msra.mxu2 %v2419_v37 }
 0x2fd   :  { %721 = vadd.xlane.f32.xlu1 %v3413_v25  ;;  %v726_v26 = vmul.f32 %v3413_v25, %v3413_v25 }
 0x2fe   :  { %1191 = vmatpush.bf16.msrb.mxu1 %v2487_v45  ;;  %v2933_v45 = vld [vmem:[#allocation7 + $0x2b4] sm:$0xf] }
 0x2ff   :  { %729 = vadd.xlane.f32.xlu2 %v726_v26  ;;  %v2921_v26 = vld [vmem:[#allocation7 + $0x250] sm:$0xf0]  ;;  %1152 = vmatpush.bf16.msra.mxu2 %v2391_v36  ;;  %v2944_v36 = vld [vmem:[#allocation7 + $0x308] sm:$0xf0] }
 0x300   :  { %v2427_v29 = vor.u32 %v2921_v26, %v2426_v24  ;;  %v2518_v24 = vld [vmem:[#allocation7 + $0x2e8] sm:$0xf]  ;;  %v2943_v26 = vld [vmem:[#allocation7 + $0x300] sm:$0xf0]  ;;  %v2527_v39 = vor.u32 %v2944_v36, %v2526_v33  ;;  %v2386_v36 = vld [vmem:[#allocation7 + $0x1d8] sm:$0xf] }
 0x301   :  { %v2519_v31 = vor.u32 %v2943_v26, %v2518_v24 }
 0x302   :  { %1179 = vmatpush.bf16.msrb.mxu0 %v2427_v29  ;;  %1192 = vmatpush.bf16.msrb.mxu1 %v2459_v58  ;;  %v2929_v58 = vld [vmem:[#allocation7 + $0x290] sm:$0xf0] }
 0x303   :  { %1153 = vmatpush.bf16.msra.mxu2 %v2363_v50  ;;  %v2495_v50 = vor.u32 %v2933_v45, %v2492_v47 }
 0x305   :  { %727 = vadd.xlane.f32.xlu1 %v725_v28  ;;  %v2423_v28 = vor.u32 %v2917_v22, %v2420_v23  ;;  %v2400_v22 = vld [vmem:[#allocation7 + $0x21c] sm:$0xf0] }
 0x306   :  { %1180 = vmatpush.bf16.msrb.mxu0 %v2399_v42  ;;  %1193 = vmatpush.bf16.msrb.mxu1 %v2431_v6  ;;  %v2403_v23 = vor.u32 %v2911_v21, %v2400_v22  ;;  %v2490_v42 = vld [vmem:[#allocation7 + $0x2b0] sm:$0xf]  ;;  %v2436_v6 = vld [vmem:[#allocation7 + $0x25c] sm:$0xf0]  ;;  %v2408_v21 = vld [vmem:[#allocation7 + $0x224] sm:$0xf0] }
 0x307   :  { %1165 = vmatpush.bf16.msrb.mxu3 %v2423_v28  ;;  %1202 = vmatpush.bf16.msrb.mxu2 %v2575_v61  ;;  %v2940_v28 = vld [vmem:[#allocation7 + $0x2ec] sm:$0xf]  ;;  %v2491_v49 = vor.u32 %v2936_v44, %v2490_v42  ;;  %v2464_v61 = vld [vmem:[#allocation7 + $0x294] sm:$0xf0]  ;;  %v2439_v13 = vor.u32 %v2919_v4, %v2436_v6  ;;  %v2414_v22 = vld [vmem:[#allocation7 + $0x210] sm:$0xf] }
 0x308   :  { %v2523_v35 = vor.u32 %v2940_v28, %v2520_v32  ;;  %v2467_v0 = vor.u32 %v2926_v59, %v2464_v61  ;;  %v2905_v32 = vld [vmem:[#allocation7 + $0x1d4] sm:$0xf] }
 0x30a   :  { %1181 = vmatpush.bf16.msrb.mxu0 %v2371_v57  ;;  %1194 = vmatpush.bf16.msrb.mxu1 %v2403_v23  ;;  %v2462_v57 = vld [vmem:[#allocation7 + $0x278] sm:$0xf] }
 0x30b   :  { %1166 = vmatpush.bf16.msrb.mxu3 %v2395_v41  ;;  %1203 = vmatpush.bf16.msrb.mxu2 %v2547_v10  ;;  %v2372_v41 = vld [vmem:[#allocation7 + $0x1e4] sm:$0xf0]  ;;  %v2463_v27 = vor.u32 %v2929_v58, %v2462_v57  ;;  %v3041_v57 = vld [vmem:[%s3544_s7] ss:$0 sm:$0xff] }
 0x30c   :  { %v2375_v43 = vor.u32 %v2904_v40, %v2372_v41  ;;  %v2406_v10 = vld [vmem:[#allocation7 + $0x208] sm:$0xf] }
 0x30e   :  { %1230 = vmatpush.bf16.msra.mxu0 %v2583_v2  ;;  %1195 = vmatpush.bf16.msrb.mxu1 %v2375_v43  ;;  %v2434_v2 = vld [vmem:[#allocation7 + $0x240] sm:$0xf] }
 0x30f   :  { %1167 = vmatpush.bf16.msrb.mxu3 %v2367_v53  ;;  %1204 = vmatpush.bf16.msrb.mxu2 %v2519_v31  ;;  %v2435_v8 = vor.u32 %v2922_v3, %v2434_v2  ;;  %v2908_v31 = vld [vmem:[#allocation7 + $0x1e8] sm:$0xf0] }
 0x312   :  { %1231 = vmatpush.bf16.msra.mxu0 %v2555_v16  ;;  %v2912_v16 = vld [vmem:[#allocation7 + $0x20c] sm:$0xf] }
 0x313   :  { %1216 = vmatpush.bf16.msra.mxu3 %v2579_v1  ;;  %1205 = vmatpush.bf16.msrb.mxu2 %v2491_v49  ;;  %v2471_v1 = vor.u32 %v2930_v63, %v2470_v62  ;;  %v2411_v28 = vor.u32 %v2912_v16, %v2408_v21  ;;  %v3040_v49 = vld [vmem:[%s3543_s6] ss:$0 sm:$0xff] }
 0x316   :  { %1232 = vmatpush.bf16.msra.mxu0 %v2527_v39 }
 0x317   :  { %1217 = vmatpush.bf16.msra.mxu3 %v2551_v12  ;;  %1206 = vmatpush.bf16.msrb.mxu2 %v2463_v27 }
 0x31b   :  { %1218 = vmatpush.bf16.msra.mxu3 %v2523_v35  ;;  %1207 = vmatpush.bf16.msrb.mxu2 %v2435_v8  ;;  %v2380_v35 = vld [vmem:[#allocation7 + $0x1ec] sm:$0xf0] }
 0x31c   :  { %v2383_v42 = vor.u32 %v2905_v32, %v2380_v35 }
 0x31f   :  { %1219 = vmatpush.bf16.msra.mxu3 %v2495_v50 }
 0x323   :  { %1220 = vmatpush.bf16.msra.mxu3 %v2467_v0 }
 0x327   :  { %1221 = vmatpush.bf16.msra.mxu3 %v2439_v13 }
 0x32b   :  { %1222 = vmatpush.bf16.msra.mxu3 %v2411_v28 }
 0x32f   :  { %1223 = vmatpush.bf16.msra.mxu3 %v2383_v42 }
 0x368   :  { %v720_v46 = vpop.xlane.xlu1 %719 }
 0x369   :  { %v3424_v34 = vmul.f32 0.03125, %v720_v46  ;;  %v2498_v46 = vld [vmem:[#allocation7 + $0x2b8] sm:$0xf] }
 0x36a   :  { %v2499_v53 = vor.u32 %v2937_v51, %v2498_v46 }
 0x36b   :  { %v733_v54 = vmul.f32 %v3424_v34, %v3424_v34 }
 0x36c   :  { %1233 = vmatpush.bf16.msra.mxu0 %v2499_v53 }
 0x370   :  { %v722_v15 = vpop.xlane.xlu1 %721  ;;  %1234 = vmatpush.bf16.msra.mxu0 %v2471_v1 }
 0x371   :  { %v3420_v19 = vmul.f32 0.03125, %v722_v15  ;;  %v2915_v15 = vld [vmem:[#allocation7 + $0x220] sm:$0xf0] }
 0x372   :  { %v730_v37 = vpop.xlane.xlu2 %729  ;;  %v2407_v26 = vor.u32 %v2915_v15, %v2406_v10 }
 0x373   :  { %v734_v29 = vmul.f32 %v3420_v19, %v3420_v19  ;;  %v732_v30 = vmul.f32 0.03125, %v730_v37  ;;  %v2916_v37 = vld [vmem:[#allocation7 + $0x228] sm:$0xf0] }
 0x374   :  { %1235 = vmatpush.bf16.msra.mxu0 %v2443_v14  ;;  %1208 = vmatpush.bf16.msrb.mxu2 %v2407_v26 }
 0x375   :  { %v736_v38 = vsub.f32 %v732_v30, %v734_v29  ;;  %v2415_v29 = vor.u32 %v2916_v37, %v2414_v22  ;;  %v2378_v30 = vld [vmem:[#allocation7 + $0x1d0] sm:$0xf] }
 0x376   :  { %v2379_v40 = vor.u32 %v2908_v31, %v2378_v30 }
 0x377   :  { %v738_v48 = vmax.f32 %v736_v38, 0.0  ;;  %v2909_v38 = vld [vmem:[#allocation7 + $0x1f0] sm:$0xf0] }
 0x378   :  { %v728_v52 = vpop.xlane.xlu1 %727  ;;  %1236 = vmatpush.bf16.msra.mxu0 %v2415_v29  ;;  %v2387_v43 = vor.u32 %v2909_v38, %v2386_v36  ;;  %1209 = vmatpush.bf16.msrb.mxu2 %v2379_v40 }
 0x379   :  { %v3428_v55 = vadd.f32 1e-05, %v738_v48  ;;  %v731_v56 = vmul.f32 0.03125, %v728_v52 }
 0x37b   :  { %3061 = vrsqrt.f32 %v3428_v55  ;;  %v735_v60 = vsub.f32 %v731_v56, %v733_v54  ;;  %vm759_vm2 = vweird.f32 %v3428_v55  ;;  %v740_v54 = vsub.f32 %v3413_v25, %v3420_v19 }
 0x37c   :  { %1237 = vmatpush.bf16.msra.mxu0 %v2387_v43  ;;  %v739_v56 = vsub.f32 %v3407_v18, %v3424_v34  ;;  %v3443_v18 = vld [vmem:[#allocation8 + $0x7] sm:$0xff] }
 0x37d   :  { %v737_v5 = vmax.f32 %v735_v60, 0.0  ;;  %v846_v34 = vperm.slane %v3443_v18, 2  ;;  %v847_v63 = vperm.slane %v3443_v18, 3  ;;  %v844_v8 = vperm.slane %v3443_v18, 0 }
 0x37e   :  { %v848_v37 = vperm.slane %v3443_v18, 4 }
 0x37f   :  { %v741_v12 = vadd.f32 1e-05, %v737_v5 }
 0x381   :  { %v3062_v23 = vpop.eup %3061  ;;  %3063 = vrsqrt.f32 %v741_v12  ;;  %vm749_vm5 = vweird.f32 %v741_v12 }
 0x382   :  { %v754_v24 = vmul.f32 %v3062_v23, %v3428_v55  ;;  %vm760_vm1 = vweird.f32 %v3062_v23 }
 0x383   :  { %vm761_vm3 = vmor %vm759_vm2, %vm760_vm1 }
 0x384   :  { %v755_v33 = vmul.f32 %v3062_v23, %v754_v24  ;;  %v845_v24 = vperm.slane %v3443_v18, 1 }
 0x386   :  { %v756_v39 = vmul.f32 0.5, %v755_v33 }
 0x387   :  { %v3064_v41 = vpop.eup %3063 }
 0x388   :  { %v757_v44 = vsub.f32 1.5, %v756_v39  ;;  %v744_v45 = vmul.f32 %v3064_v41, %v741_v12  ;;  %vm750_vm4 = vweird.f32 %v3064_v41 }
 0x389   :  { %vm751_vm6 = vmor %vm749_vm5, %vm750_vm4 }
 0x38a   :  { %v758_v47 = vmul.f32 %v3062_v23, %v757_v44  ;;  %v745_v48 = vmul.f32 %v3064_v41, %v744_v45 }
 0x38c   :  { %v762_v50 = vsel %vm761_vm3, %v3062_v23, %v758_v47  ;;  %v746_v46 = vmul.f32 0.5, %v745_v48  ;;  %v849_v23 = vperm.slane %v3443_v18, 5 }
 0x38d   :  { %v767_v52 = vmul.f32 %v3040_v49, %v762_v50 }
 0x38e   :  { %v747_v51 = vsub.f32 1.5, %v746_v46 }
 0x38f   :  { %v769_v58 = vmul.f32 %v767_v52, %v740_v54 }
 0x390   :  { %v748_v53 = vmul.f32 %v3064_v41, %v747_v51  ;;  %v3459_v51 = vld [vmem:[#allocation2 + $0x8] sm:$0xff] }
 0x391   :  { %v774_v27 = vadd.f32 %v3041_v57, %v769_v58 }
 0x392   :  { %v752_v55 = vsel %vm751_vm6, %v3064_v41, %v748_v53  ;;  %v3451_v41 = vld [vmem:[#allocation2] sm:$0xff] }
 0x393   :  { %v766_v59 = vmul.f32 %v3040_v49, %v752_v55 }
 0x395   :  { %v768_v60 = vmul.f32 %v766_v59, %v739_v56 }
 0x397   :  { %v773_v61 = vadd.f32 %v3041_v57, %v768_v60 }
 0x399   :  { %v775_v62 = vpack.c.bf16 %v774_v27, %v773_v61 }
 0x39b   :  { %1154 = vmatmul.bf16.vlgmr.msra.gmra.mxu2 %v775_v62  ;;  %1168 = vmatmul.bf16.vlgmr.msrb.gmra.mxu3 %v775_v62 }
 0x39c   :  { %1182 = vmatmul.bf16.vlgmr.msrb.gmra.mxu0 %v775_v62  ;;  %1196 = vmatmul.bf16.vlgmr.msrb.gmra.mxu1 %v775_v62 }
 0x3ab   :  { %1210 = vmatmul.bf16.vlgmr.msrb.gmra.mxu2 %v775_v62  ;;  %1224 = vmatmul.bf16.vlgmr.msra.gmra.mxu3 %v775_v62 }
 0x3ac   :  { %1238 = vmatmul.bf16.vlgmr.msra.gmra.mxu0 %v775_v62 }
 0x419   :  { %v1183_v25 = vpop.f32.mrf.mxu0  ;;  %v1197_v19 = vpop.f32.mrf.mxu1 }
 0x41a   :  { %v1184_v4 = vadd.f32 %v1183_v25, %v846_v34  ;;  %v1198_v5 = vadd.f32 %v1197_v19, %v847_v63 }
 0x41e   :  { %v1155_v0 = vpop.f32.mrf.mxu2  ;;  %v1169_v1 = vpop.f32.mrf.mxu3 }
 0x41f   :  { %v1156_v14 = vadd.f32 %v1155_v0, %v844_v8  ;;  %v1170_v35 = vadd.f32 %v1169_v1, %v845_v24 }
 0x421   :  { %v1185_v2 = vpop.f32.mrf.mxu0  ;;  %v1199_v3 = vpop.f32.mrf.mxu1 }
 0x422   :  { %v1186_v6 = vadd.f32 %v1185_v2, %v846_v34  ;;  %v1200_v7 = vadd.f32 %v1199_v3, %v847_v63 }
 0x424   :  { %v1245_v9 = vpack.c.bf16 %v1186_v6, %v1184_v4  ;;  %v1285_v10 = vpack.c.bf16 %v1200_v7, %v1198_v5 }
 0x426   :  { %1254 = vmatpush.bf16.xpose.msra.mxu1 %v1245_v9  ;;  %v1157_v12 = vpop.f32.mrf.mxu2  ;;  %v1171_v13 = vpop.f32.mrf.mxu3 }
 0x427   :  { %v1158_v15 = vadd.f32 %v1157_v12, %v844_v8  ;;  %v1172_v26 = vadd.f32 %v1171_v13, %v845_v24 }
 0x429   :  { %v1244_v16 = vpack.c.bf16 %v1158_v15, %v1156_v14  ;;  %v1284_v39 = vpack.c.bf16 %v1172_v26, %v1170_v35  ;;  %v850_v26 = vperm.slane %v3443_v18, 6 }
 0x42d   :  { %1255 = vmatmul.bf16.vlgmr.msra.gmra.mxu1 %v1244_v16 }
 0x42e   :  { %1294 = vmatpush.bf16.xpose.msrb.mxu1 %v1285_v10  ;;  %v1211_v21 = vpop.f32.mrf.mxu2  ;;  %v1225_v22 = vpop.f32.mrf.mxu3 }
 0x42f   :  { %v1212_v30 = vadd.f32 %v1211_v21, %v848_v37  ;;  %v1226_v31 = vadd.f32 %v1225_v22, %v849_v23 }
 0x436   :  { %v1213_v28 = vpop.f32.mrf.mxu2  ;;  %v1227_v29 = vpop.f32.mrf.mxu3 }
 0x437   :  { %v1214_v32 = vadd.f32 %v1213_v28, %v848_v37  ;;  %v1228_v33 = vadd.f32 %v1227_v29, %v849_v23  ;;  %v1239_v23 = vpop.f32.mrf.mxu0 }
 0x439   :  { %v1246_v36 = vpack.c.bf16 %v1214_v32, %v1212_v30  ;;  %v1286_v38 = vpack.c.bf16 %v1228_v33, %v1226_v31  ;;  %v1240_v30 = vadd.f32 %v1239_v23, %v850_v26  ;;  %v2980_v23 = vld [vmem:[#allocation7 + $0x42c] sm:$0xf] }
 0x43b   :  { %1334 = vmatpush.bf16.msra.mxu2 %v1286_v38  ;;  %1351 = vmatpush.bf16.msrb.mxu3 %v1246_v36 }
 0x43d   :  { %1295 = vmatmul.bf16.vlgmr.msrb.gmra.mxu1 %v1284_v39 }
 0x43f   :  { %v1241_v33 = vpop.f32.mrf.mxu0 }
 0x4aa   :  { %v1256_v40 = vpop.f32.mrf.mxu1 }
 0x4ab   :  { %v1257_v42 = vadd.f32 %v3451_v41, %v1256_v40  ;;  %v1242_v40 = vadd.f32 %v1241_v33, %v850_v26  ;;  %v2676_v26 = vld [vmem:[#allocation7 + $0x444] sm:$0xf0]  ;;  %v2768_v33 = vld [vmem:[#allocation7 + $0x4f4] sm:$0xf0] }
 0x4ad   :  { %v1261_v43 = vsel %vm603_vm0, %v1257_v42, -inf }
 0x4ae   :  { %1262 = vmax.xlane.f32.xlu1 %v1261_v43 }
 0x4b2   :  { %v1258_v44 = vpop.f32.mrf.mxu1 }
 0x4b3   :  { %v1259_v45 = vadd.f32 %v1258_v44, %v3362_v20 }
 0x4b5   :  { %v1264_v47 = vsel %vm603_vm0, %v1259_v45, -inf }
 0x4b6   :  { %1265 = vmax.xlane.f32.xlu1 %v1264_v47  ;;  %v2786_v47 = vld [vmem:[#allocation7 + $0x508] sm:$0xf] }
 0x4ba   :  { %v1296_v48 = vpop.f32.mrf.mxu1 }
 0x4bb   :  { %v1297_v49 = vadd.f32 %v3451_v41, %v1296_v48  ;;  %v3011_v48 = vld [vmem:[#allocation7 + $0x520] sm:$0xf0] }
 0x4bd   :  { %v1301_v50 = vsel %vm603_vm0, %v1297_v49, -inf }
 0x4be   :  { %1302 = vmax.xlane.f32.xlu0 %v1301_v50  ;;  %v2787_v50 = vor.u32 %v3011_v48, %v2786_v47 }
 0x4c0   :  { %1795 = vmatpush.bf16.msrb.mxu0 %v2787_v50  ;;  %v2740_v50 = vld [vmem:[#allocation7 + $0x4bc] sm:$0xf0] }
 0x4c2   :  { %v1298_v46 = vpop.f32.mrf.mxu1 }
 0x4c3   :  { %v1299_v52 = vadd.f32 %v3459_v51, %v1298_v46  ;;  %v2788_v46 = vld [vmem:[#allocation7 + $0x524] sm:$0xf0] }
 0x4c5   :  { %v1304_v53 = vsel %vm603_vm0, %v1299_v52, -inf }
 0x4c6   :  { %1305 = vmax.xlane.f32.xlu1 %v1304_v53  ;;  %v3012_v53 = vld [vmem:[#allocation7 + $0x528] sm:$0xf0] }
 0x521   :  { %v1263_v54 = vpop.xlane.xlu1 %1262 }
 0x522   :  { %v1267_v55 = vsub.f32 %v1257_v42, %v1263_v54 }
 0x524   :  { %v1269_v20 = vmul.f32 1.442695, %v1267_v55 }
 0x526   :  { %3065 = vpow2.f32 %v1269_v20  ;;  %v2758_v20 = vld [vmem:[#allocation7 + $0x4d0] sm:$0xf] }
 0x529   :  { %v1266_v56 = vpop.xlane.xlu1 %1265 }
 0x52a   :  { %v1268_v57 = vsub.f32 %v1259_v45, %v1266_v56  ;;  %v3004_v56 = vld [vmem:[#allocation7 + $0x4e8] sm:$0xf0] }
 0x52c   :  { %v3066_v58 = vpop.eup %3065  ;;  %v1271_v59 = vmul.f32 1.442695, %v1268_v57  ;;  %v3001_v57 = vld [vmem:[#allocation7 + $0x4d4] sm:$0xf] }
 0x52d   :  { %v1273_v60 = vsel %vm603_vm0, %v3066_v58, 0.0 }
 0x52e   :  { %3067 = vpow2.f32 %v1271_v59  ;;  %1274 = vadd.xlane.f32.xlu1 %v1273_v60  ;;  %v2760_v59 = vld [vmem:[#allocation7 + $0x4ec] sm:$0xf0]  ;;  %v2766_v60 = vld [vmem:[#allocation7 + $0x4d8] sm:$0xf] }
 0x531   :  { %v1303_v27 = vpop.xlane.xlu0 %1302 }
 0x532   :  { %v1307_v61 = vsub.f32 %v1297_v49, %v1303_v27  ;;  %v3008_v49 = vld [vmem:[#allocation7 + $0x50c] sm:$0xf]  ;;  %v3005_v27 = vld [vmem:[#allocation7 + $0x4f0] sm:$0xf0] }
 0x533   :  { %v2791_v54 = vor.u32 %v3008_v49, %v2788_v46  ;;  %v2995_v49 = vld [vmem:[#allocation7 + $0x4a4] sm:$0xf] }
 0x534   :  { %v3068_v62 = vpop.eup %3067  ;;  %v1309_v25 = vmul.f32 1.442695, %v1307_v61  ;;  %v2763_v61 = vor.u32 %v3001_v57, %v2760_v59  ;;  %v2743_v46 = vor.u32 %v2995_v49, %v2740_v50  ;;  %v2970_v57 = vld [vmem:[#allocation7 + $0x3d8] sm:$0xf0]  ;;  %v2999_v49 = vld [vmem:[#allocation7 + $0x4c0] sm:$0xf0] }
 0x535   :  { %v1276_v19 = vsel %vm603_vm0, %v3068_v62, 0.0  ;;  %1809 = vmatpush.bf16.msra.mxu1 %v2791_v54  ;;  %v2966_v54 = vld [vmem:[#allocation7 + $0x3bc] sm:$0xf]  ;;  %v2996_v50 = vld [vmem:[#allocation7 + $0x4ac] sm:$0xf] }
 0x536   :  { %3069 = vpow2.f32 %v1309_v25  ;;  %1277 = vadd.xlane.f32.xlu1 %v1276_v19  ;;  %v2730_v25 = vld [vmem:[#allocation7 + $0x498] sm:$0xf]  ;;  %v2997_v19 = vld [vmem:[#allocation7 + $0x4b0] sm:$0xf0] }
 0x539   :  { %v1306_v34 = vpop.xlane.xlu1 %1305  ;;  %1810 = vmatpush.bf16.msra.mxu1 %v2763_v61 }
 0x53a   :  { %v1308_v63 = vsub.f32 %v1299_v52, %v1306_v34  ;;  %v2794_v52 = vld [vmem:[#allocation7 + $0x510] sm:$0xf]  ;;  %v2994_v34 = vld [vmem:[#allocation7 + $0x49c] sm:$0xf] }
 0x53b   :  { %v2795_v55 = vor.u32 %v3012_v53, %v2794_v52  ;;  %v2618_v52 = vld [vmem:[#allocation7 + $0x3b8] sm:$0xf]  ;;  %v2969_v53 = vld [vmem:[#allocation7 + $0x3d0] sm:$0xf0] }
 0x53c   :  { %v3070_v0 = vpop.eup %3069  ;;  %v1311_v1 = vmul.f32 1.442695, %v1308_v63  ;;  %v2731_v63 = vor.u32 %v2997_v19, %v2730_v25  ;;  %v2590_v25 = vld [vmem:[#allocation7 + $0x380] sm:$0xf]  ;;  %v2962_v19 = vld [vmem:[#allocation7 + $0x398] sm:$0xf0] }
 0x53d   :  { %v1313_v2 = vsel %vm603_vm0, %v3070_v0, 0.0  ;;  %1823 = vmatpush.bf16.msrb.mxu2 %v2795_v55  ;;  %v2619_v55 = vor.u32 %v2969_v53, %v2618_v52  ;;  %v2748_v52 = vld [vmem:[#allocation7 + $0x4c4] sm:$0xf0]  ;;  %v2754_v53 = vld [vmem:[#allocation7 + $0x4b0] sm:$0xf] }
 0x53e   :  { %3071 = vpow2.f32 %v1311_v1  ;;  %1314 = vadd.xlane.f32.xlu2 %v1313_v2  ;;  %v2738_v1 = vld [vmem:[#allocation7 + $0x4a0] sm:$0xf]  ;;  %v2998_v2 = vld [vmem:[#allocation7 + $0x4b8] sm:$0xf0] }
 0x544   :  { %v3072_v3 = vpop.eup %3071 }
 0x545   :  { %v1316_v4 = vsel %vm603_vm0, %v3072_v3, 0.0 }
 0x546   :  { %1317 = vadd.xlane.f32.xlu1 %v1316_v4  ;;  %v2739_v4 = vor.u32 %v2998_v2, %v2738_v1  ;;  %v2592_v1 = vld [vmem:[#allocation7 + $0x39c] sm:$0xf0]  ;;  %v2598_v2 = vld [vmem:[#allocation7 + $0x388] sm:$0xf] }
 0x5a1   :  { %v1275_v5 = vpop.xlane.xlu1 %1274 }
 0x5a2   :  { %3073 = vrcp.f32 %v1275_v5  ;;  %v2702_v5 = vld [vmem:[#allocation7 + $0x460] sm:$0xf] }
 0x5a8   :  { %v3074_v7 = vpop.eup %3073 }
 0x5a9   :  { %v1278_v6 = vpop.xlane.xlu1 %1277  ;;  %v1281_v9 = vmul.f32 %v3074_v7, %v3066_v58  ;;  %v2759_v58 = vor.u32 %v3004_v56, %v2758_v20  ;;  %v2987_v7 = vld [vmem:[#allocation7 + $0x464] sm:$0xf]  ;;  %v2620_v20 = vld [vmem:[#allocation7 + $0x3d4] sm:$0xf0]  ;;  %v2626_v56 = vld [vmem:[#allocation7 + $0x3c0] sm:$0xf] }
 0x5aa   :  { %3075 = vrcp.f32 %v1278_v6  ;;  %v2990_v6 = vld [vmem:[#allocation7 + $0x478] sm:$0xf0]  ;;  %v2627_v59 = vor.u32 %v2970_v57, %v2626_v56 }
 0x5ab   :  { %1796 = vmatpush.bf16.msrb.mxu0 %v2759_v58  ;;  %v2623_v58 = vor.u32 %v2966_v54, %v2620_v20  ;;  %v3000_v54 = vld [vmem:[#allocation7 + $0x4c8] sm:$0xf0]  ;;  %v2751_v20 = vor.u32 %v2996_v50, %v2748_v52  ;;  %v2606_v50 = vld [vmem:[#allocation7 + $0x390] sm:$0xf] }
 0x5ac   :  { %v2755_v56 = vor.u32 %v3000_v54, %v2754_v53  ;;  %v2964_v53 = vld [vmem:[#allocation7 + $0x3a8] sm:$0xf0]  ;;  %v2961_v54 = vld [vmem:[#allocation7 + $0x394] sm:$0xf] }
 0x5af   :  { %1797 = vmatpush.bf16.msrb.mxu0 %v2731_v63 }
 0x5b0   :  { %v3076_v8 = vpop.eup %3075 }
 0x5b1   :  { %v1282_v10 = vmul.f32 %v3076_v8, %v3068_v62  ;;  %v1315_v13 = vpop.xlane.xlu2 %1314  ;;  %v2767_v62 = vor.u32 %v3005_v27, %v2766_v60  ;;  %v2703_v8 = vor.u32 %v2990_v6, %v2702_v5  ;;  %v2988_v60 = vld [vmem:[#allocation7 + $0x46c] sm:$0xf]  ;;  %v2712_v27 = vld [vmem:[#allocation7 + $0x484] sm:$0xf0]  ;;  %v2981_v5 = vld [vmem:[#allocation7 + $0x434] sm:$0xf] }
 0x5b2   :  { %3077 = vrcp.f32 %v1315_v13  ;;  %v2715_v61 = vor.u32 %v2988_v60, %v2712_v27  ;;  %v2684_v6 = vld [vmem:[#allocation7 + $0x44c] sm:$0xf0]  ;;  %v2600_v60 = vld [vmem:[#allocation7 + $0x3a4] sm:$0xf0] }
 0x5b3   :  { %v1283_v12 = vpack.c.bf16 %v1282_v10, %v1281_v9  ;;  %1824 = vmatpush.bf16.msrb.mxu2 %v2767_v62  ;;  %v2704_v9 = vld [vmem:[#allocation7 + $0x47c] sm:$0xf0]  ;;  %v2710_v10 = vld [vmem:[#allocation7 + $0x468] sm:$0xf]  ;;  %1798 = vmatpush.bf16.msrb.mxu0 %v2703_v8  ;;  %v2687_v8 = vor.u32 %v2981_v5, %v2684_v6 }
 0x5b4   :  { %v2707_v13 = vor.u32 %v2987_v7, %v2704_v9  ;;  %v2802_v9 = vld [vmem:[#allocation7 + $0x518] sm:$0xf] }
 0x5b5   :  { %2585 = vmatmul.msk.bf16.vlgmr.msrb.gmra.mxu3 %vm603_vm0, %v1283_v12  ;;  %v2991_v12 = vld [vmem:[#allocation7 + $0x480] sm:$0xf0] }
 0x5b7   :  { %1825 = vmatpush.bf16.msrb.mxu2 %v2739_v4  ;;  %v2963_v4 = vld [vmem:[#allocation7 + $0x3a0] sm:$0xf0] }
 0x5b8   :  { %v3078_v15 = vpop.eup %3077  ;;  %v2599_v7 = vor.u32 %v2963_v4, %v2598_v2  ;;  %v2993_v4 = vld [vmem:[#allocation7 + $0x490] sm:$0xf0] }
 0x5b9   :  { %v1318_v14 = vpop.xlane.xlu1 %1317  ;;  %v1321_v21 = vmul.f32 %v3078_v15, %v3070_v0  ;;  %v2732_v0 = vld [vmem:[#allocation7 + $0x4b4] sm:$0xf0]  ;;  %v3009_v15 = vld [vmem:[#allocation7 + $0x514] sm:$0xf] }
 0x5ba   :  { %3079 = vrcp.f32 %v1318_v14  ;;  %v2711_v14 = vor.u32 %v2991_v12, %v2710_v10  ;;  %v3013_v10 = vld [vmem:[#allocation7 + $0x530] sm:$0xf0]  ;;  %v3010_v12 = vld [vmem:[#allocation7 + $0x51c] sm:$0xf] }
 0x5bc   :  { %1826 = vmatpush.bf16.msrb.mxu2 %v2711_v14  ;;  %v2804_v14 = vld [vmem:[#allocation7 + $0x534] sm:$0xf0] }
 0x5c0   :  { %v3080_v16 = vpop.eup %3079 }
 0x5c1   :  { %v1322_v22 = vmul.f32 %v3080_v16, %v3072_v3  ;;  %v2735_v3 = vor.u32 %v2994_v34, %v2732_v0  ;;  %v2796_v16 = vld [vmem:[#allocation7 + $0x52c] sm:$0xf0]  ;;  %v2959_v34 = vld [vmem:[#allocation7 + $0x384] sm:$0xf]  ;;  %v2591_v0 = vor.u32 %v2962_v19, %v2590_v25  ;;  %v2989_v25 = vld [vmem:[#allocation7 + $0x474] sm:$0xf] }
 0x5c3   :  { %v1323_v37 = vpack.c.bf16 %v1322_v22, %v1321_v21  ;;  %1811 = vmatpush.bf16.msra.mxu1 %v2735_v3  ;;  %v2799_v21 = vor.u32 %v3009_v15, %v2796_v16  ;;  %v2674_v22 = vld [vmem:[#allocation7 + $0x428] sm:$0xf]  ;;  %v2595_v3 = vor.u32 %v2959_v34, %v2592_v1  ;;  %v2810_v15 = vld [vmem:[#allocation7 + $0x520] sm:$0xf]  ;;  %v3014_v16 = vld [vmem:[#allocation7 + $0x538] sm:$0xf0] }
 0x5c4   :  { %v2726_v1 = vld [vmem:[#allocation7 + $0x478] sm:$0xf] }
 0x5c5   :  { %2584 = vmatmul.msk.bf16.vlgmr.msra.gmra.mxu2 %vm603_vm0, %v1323_v37  ;;  %v2983_v37 = vld [vmem:[#allocation7 + $0x440] sm:$0xf0]  ;;  %1837 = vmatpush.bf16.msra.mxu3 %v2799_v21  ;;  %v2807_v21 = vor.u32 %v3010_v12, %v2804_v14  ;;  %v2692_v14 = vld [vmem:[#allocation7 + $0x454] sm:$0xf0] }
 0x5c7   :  { %1812 = vmatpush.bf16.msra.mxu1 %v2707_v13  ;;  %v2803_v13 = vor.u32 %v3013_v10, %v2802_v9  ;;  %v2985_v9 = vld [vmem:[#allocation7 + $0x450] sm:$0xf0]  ;;  %v2982_v10 = vld [vmem:[#allocation7 + $0x43c] sm:$0xf] }
 0x638   :  { %v1353_v24 = vpop.f32.mrf.mxu3 }
 0x640   :  { %v1355_v36 = vpop.f32.mrf.mxu3 }
 0x648   :  { %v1336_v28 = vpop.f32.mrf.mxu2 }
 0x649   :  { %v1354_v29 = vadd.f32 %v1353_v24, %v1336_v28  ;;  %v2675_v24 = vor.u32 %v2983_v37, %v2674_v22  ;;  %v2682_v28 = vld [vmem:[#allocation7 + $0x430] sm:$0xf]  ;;  %v2811_v22 = vor.u32 %v3014_v16, %v2810_v15  ;;  %v2974_v37 = vld [vmem:[#allocation7 + $0x3fc] sm:$0xf]  ;;  %v2698_v15 = vld [vmem:[#allocation7 + $0x440] sm:$0xf] }
 0x64a   :  { %v2986_v16 = vld [vmem:[#allocation7 + $0x458] sm:$0xf0] }
 0x64b   :  { %v1358_v31 = vmul.f32 %v1354_v29, %v3404_v11  ;;  %v2984_v29 = vld [vmem:[#allocation7 + $0x448] sm:$0xf0]  ;;  %1799 = vmatpush.bf16.msrb.mxu0 %v2675_v24  ;;  %v2774_v24 = vld [vmem:[#allocation7 + $0x4e0] sm:$0xf] }
 0x64d   :  { %v1360_v32 = vadd.f32 %v1358_v31, %v1240_v30  ;;  %v2679_v30 = vor.u32 %v2980_v23, %v2676_v26  ;;  %v2683_v31 = vor.u32 %v2984_v29, %v2682_v28  ;;  %v2656_v23 = vld [vmem:[#allocation7 + $0x414] sm:$0xf0]  ;;  %v3006_v28 = vld [vmem:[#allocation7 + $0x4f8] sm:$0xf0]  ;;  %v3003_v29 = vld [vmem:[#allocation7 + $0x4e4] sm:$0xf] }
 0x64e   :  { %v2659_v26 = vor.u32 %v2974_v37, %v2656_v23  ;;  %v2662_v37 = vld [vmem:[#allocation7 + $0x400] sm:$0xf]  ;;  %v2978_v23 = vld [vmem:[#allocation7 + $0x418] sm:$0xf0] }
 0x64f   :  { %v3471_v35 = vmax.f32 %v1360_v32, 0.0  ;;  %v3002_v32 = vld [vmem:[#allocation7 + $0x4dc] sm:$0xf]  ;;  %1813 = vmatpush.bf16.msra.mxu1 %v2679_v30  ;;  %1827 = vmatpush.bf16.msrb.mxu2 %v2683_v31  ;;  %v2776_v30 = vld [vmem:[#allocation7 + $0x4fc] sm:$0xf0]  ;;  %v2775_v31 = vor.u32 %v3006_v28, %v2774_v24 }
 0x650   :  { %v1338_v38 = vpop.f32.mrf.mxu2  ;;  %v2975_v24 = vld [vmem:[#allocation7 + $0x404] sm:$0xf]  ;;  %v2664_v28 = vld [vmem:[#allocation7 + $0x41c] sm:$0xf0] }
 0x651   :  { %v1356_v39 = vadd.f32 %v1355_v36, %v1338_v38  ;;  %1368 = vadd.xlane.f32.xlu2 %v3471_v35  ;;  %v1374_v18 = vmul.f32 %v3471_v35, %v3471_v35  ;;  %v2771_v36 = vor.u32 %v3002_v32, %v2768_v33  ;;  %v2646_v38 = vld [vmem:[#allocation7 + $0x3f0] sm:$0xf]  ;;  %v2779_v32 = vor.u32 %v3003_v29, %v2776_v30  ;;  %v2782_v33 = vld [vmem:[#allocation7 + $0x4e8] sm:$0xf] }
 0x652   :  { %v2670_v29 = vld [vmem:[#allocation7 + $0x408] sm:$0xf]  ;;  %v2663_v30 = vor.u32 %v2978_v23, %v2662_v37 }
 0x653   :  { %v1359_v42 = vmul.f32 %v1356_v39, %v3409_v17  ;;  %v2976_v39 = vld [vmem:[#allocation7 + $0x408] sm:$0xf0]  ;;  %1838 = vmatpush.bf16.msra.mxu3 %v2771_v36  ;;  %v3007_v36 = vld [vmem:[#allocation7 + $0x500] sm:$0xf0] }
 0x655   :  { %v1361_v43 = vadd.f32 %v1359_v42, %v1242_v40  ;;  %v2973_v40 = vld [vmem:[#allocation7 + $0x3f4] sm:$0xf]  ;;  %v2647_v42 = vor.u32 %v2976_v39, %v2646_v38 }
 0x657   :  { %v3477_v44 = vmax.f32 %v1361_v43, 0.0  ;;  %v2648_v43 = vld [vmem:[#allocation7 + $0x40c] sm:$0xf0]  ;;  %1800 = vmatpush.bf16.msrb.mxu0 %v2647_v42  ;;  %1839 = vmatpush.bf16.msra.mxu3 %v2743_v46 }
 0x658   :  { %v2651_v47 = vor.u32 %v2973_v40, %v2648_v43  ;;  %v2783_v40 = vor.u32 %v3007_v36, %v2782_v33 }
 0x659   :  { %1376 = vadd.xlane.f32.xlu2 %v1374_v18  ;;  %1370 = vadd.xlane.f32.xlu1 %v3477_v44  ;;  %v1375_v45 = vmul.f32 %v3477_v44, %v3477_v44  ;;  %v2654_v18 = vld [vmem:[#allocation7 + $0x3f8] sm:$0xf] }
 0x65a   :  { %1814 = vmatpush.bf16.msra.mxu1 %v2651_v47 }
 0x65b   :  { %1801 = vmatpush.bf16.msrb.mxu0 %v2619_v55  ;;  %1840 = vmatpush.bf16.msra.mxu3 %v2715_v61  ;;  %v2718_v61 = vld [vmem:[#allocation7 + $0x470] sm:$0xf] }
 0x65e   :  { %1815 = vmatpush.bf16.msra.mxu1 %v2623_v58 }
 0x65f   :  { %1802 = vmatpush.bf16.msrb.mxu0 %v2591_v0  ;;  %1841 = vmatpush.bf16.msra.mxu3 %v2687_v8  ;;  %v2720_v0 = vld [vmem:[#allocation7 + $0x48c] sm:$0xf0]  ;;  %v2690_v8 = vld [vmem:[#allocation7 + $0x438] sm:$0xf] }
 0x661   :  { %1378 = vadd.xlane.f32.xlu1 %v1375_v45  ;;  %v2977_v45 = vld [vmem:[#allocation7 + $0x410] sm:$0xf0] }
 0x662   :  { %v2655_v48 = vor.u32 %v2977_v45, %v2654_v18  ;;  %1816 = vmatpush.bf16.msra.mxu1 %v2595_v3  ;;  %v2967_v18 = vld [vmem:[#allocation7 + $0x3c4] sm:$0xf]  ;;  %v2628_v45 = vld [vmem:[#allocation7 + $0x3dc] sm:$0xf0]  ;;  %v2723_v3 = vor.u32 %v2989_v25, %v2720_v0 }
 0x663   :  { %1851 = vmatpush.bf16.msra.mxu0 %v2803_v13  ;;  %1842 = vmatpush.bf16.msra.mxu3 %v2659_v26  ;;  %v2631_v47 = vor.u32 %v2967_v18, %v2628_v45  ;;  %v2691_v13 = vor.u32 %v2985_v9, %v2690_v8  ;;  %v2636_v18 = vld [vmem:[#allocation7 + $0x3e4] sm:$0xf0]  ;;  %v2642_v45 = vld [vmem:[#allocation7 + $0x3d0] sm:$0xf]  ;;  %v3043_v8 = vld [vmem:[%s3544_s7 + $0x1] ss:$0 sm:$0xff] }
 0x664   :  { %1828 = vmatpush.bf16.msrb.mxu2 %v2655_v48  ;;  %v2746_v48 = vld [vmem:[#allocation7 + $0x4a8] sm:$0xf] }
 0x665   :  { %v2747_v55 = vor.u32 %v2999_v49, %v2746_v48 }
 0x666   :  { %1865 = vmatpush.bf16.msrb.mxu1 %v2807_v21  ;;  %v2695_v21 = vor.u32 %v2982_v10, %v2692_v14 }
 0x667   :  { %1852 = vmatpush.bf16.msra.mxu0 %v2775_v31  ;;  %1843 = vmatpush.bf16.msra.mxu3 %v2631_v47  ;;  %v2979_v31 = vld [vmem:[#allocation7 + $0x420] sm:$0xf0]  ;;  %v2972_v47 = vld [vmem:[#allocation7 + $0x3e8] sm:$0xf0] }
 0x668   :  { %1829 = vmatpush.bf16.msrb.mxu2 %v2627_v59  ;;  %v2960_v59 = vld [vmem:[#allocation7 + $0x38c] sm:$0xf]  ;;  %v2643_v52 = vor.u32 %v2972_v47, %v2642_v45 }
 0x669   :  { %v2603_v27 = vor.u32 %v2960_v59, %v2600_v60  ;;  %v2607_v60 = vor.u32 %v2964_v53, %v2606_v50 }
 0x66a   :  { %1866 = vmatpush.bf16.msrb.mxu1 %v2779_v32  ;;  %v2634_v32 = vld [vmem:[#allocation7 + $0x3c8] sm:$0xf] }
 0x66b   :  { %1853 = vmatpush.bf16.msra.mxu0 %v2747_v55  ;;  %1844 = vmatpush.bf16.msra.mxu3 %v2603_v27  ;;  %v2608_v55 = vld [vmem:[#allocation7 + $0x3ac] sm:$0xf0] }
 0x66c   :  { %1830 = vmatpush.bf16.msrb.mxu2 %v2599_v7  ;;  %v2727_v7 = vor.u32 %v2993_v4, %v2726_v1  ;;  %v3042_v1 = vld [vmem:[%s3543_s6 + $0x1] ss:$0 sm:$0xff] }
 0x66e   :  { %1867 = vmatpush.bf16.msrb.mxu1 %v2751_v20 }
 0x670   :  { %1879 = vmatpush.bf16.msra.mxu2 %v2811_v22  ;;  %v2699_v22 = vor.u32 %v2986_v16, %v2698_v15 }
 0x672   :  { %1868 = vmatpush.bf16.msrb.mxu1 %v2723_v3 }
 0x674   :  { %1880 = vmatpush.bf16.msra.mxu2 %v2783_v40  ;;  %v2971_v40 = vld [vmem:[#allocation7 + $0x3e0] sm:$0xf0] }
 0x675   :  { %v2635_v49 = vor.u32 %v2971_v40, %v2634_v32 }
 0x676   :  { %1869 = vmatpush.bf16.msrb.mxu1 %v2695_v21 }
 0x678   :  { %1881 = vmatpush.bf16.msra.mxu2 %v2755_v56  ;;  %v2614_v56 = vld [vmem:[#allocation7 + $0x398] sm:$0xf] }
 0x67c   :  { %1882 = vmatpush.bf16.msra.mxu2 %v2727_v7 }
 0x680   :  { %1883 = vmatpush.bf16.msra.mxu2 %v2699_v22 }
 0x6c4   :  { %v1369_v62 = vpop.xlane.xlu2 %1368 }
 0x6c5   :  { %v3482_v63 = vmul.f32 0.03125, %v1369_v62  ;;  %v2992_v62 = vld [vmem:[#allocation7 + $0x488] sm:$0xf0] }
 0x6c6   :  { %v2719_v34 = vor.u32 %v2992_v62, %v2718_v61  ;;  %v2611_v61 = vor.u32 %v2961_v54, %v2608_v55 }
 0x6c7   :  { %v1382_v42 = vmul.f32 %v3482_v63, %v3482_v63  ;;  %v1388_v7 = vsub.f32 %v3471_v35, %v3482_v63 }
 0x6c8   :  { %1854 = vmatpush.bf16.msra.mxu0 %v2719_v34 }
 0x6cc   :  { %v1377_v38 = vpop.xlane.xlu2 %1376  ;;  %v1371_v39 = vpop.xlane.xlu1 %1370  ;;  %1855 = vmatpush.bf16.msra.mxu0 %v2691_v13 }
 0x6cd   :  { %v1380_v43 = vmul.f32 0.03125, %v1377_v38  ;;  %v3486_v58 = vmul.f32 0.03125, %v1371_v39  ;;  %v2667_v38 = vor.u32 %v2975_v24, %v2664_v28  ;;  %v2671_v39 = vor.u32 %v2979_v31, %v2670_v29  ;;  %v3505_v24 = vld [vmem:[#allocation8 + $0xe] sm:$0xff] }
 0x6cf   :  { %v1384_v46 = vsub.f32 %v1380_v43, %v1382_v42  ;;  %v1383_v5 = vmul.f32 %v3486_v58, %v3486_v58  ;;  %v2968_v42 = vld [vmem:[#allocation7 + $0x3cc] sm:$0xf]  ;;  %1870 = vmatpush.bf16.msrb.mxu1 %v2667_v38  ;;  %1884 = vmatpush.bf16.msra.mxu2 %v2671_v39  ;;  %v1389_v10 = vsub.f32 %v3477_v44, %v3486_v58  ;;  %v1495_v44 = vperm.slane %v3505_v24, 2 }
 0x6d0   :  { %1856 = vmatpush.bf16.msra.mxu0 %v2663_v30  ;;  %v1496_v58 = vperm.slane %v3505_v24, 3  ;;  %v1493_v38 = vperm.slane %v3505_v24, 0 }
 0x6d1   :  { %v1386_v57 = vmax.f32 %v1384_v46, 0.0  ;;  %v2639_v46 = vor.u32 %v2968_v42, %v2636_v18  ;;  %v1498_v18 = vperm.slane %v3505_v24, 5 }
 0x6d3   :  { %v3488_v19 = vadd.f32 1e-05, %v1386_v57  ;;  %v2965_v57 = vld [vmem:[#allocation7 + $0x3b0] sm:$0xf0]  ;;  %1871 = vmatpush.bf16.msrb.mxu1 %v2639_v46  ;;  %1885 = vmatpush.bf16.msra.mxu2 %v2643_v52 }
 0x6d4   :  { %v1379_v2 = vpop.xlane.xlu1 %1378  ;;  %1857 = vmatpush.bf16.msra.mxu0 %v2635_v49  ;;  %v2615_v62 = vor.u32 %v2965_v57, %v2614_v56 }
 0x6d5   :  { %3081 = vrsqrt.f32 %v3488_v19  ;;  %v1381_v6 = vmul.f32 0.03125, %v1379_v2  ;;  %vm1398_vm8 = vweird.f32 %v3488_v19 }
 0x6d7   :  { %v1385_v12 = vsub.f32 %v1381_v6, %v1383_v5  ;;  %1872 = vmatpush.bf16.msrb.mxu1 %v2611_v61  ;;  %1886 = vmatpush.bf16.msra.mxu2 %v2615_v62 }
 0x6d8   :  { %1858 = vmatpush.bf16.msra.mxu0 %v2607_v60 }
 0x6d9   :  { %v1387_v26 = vmax.f32 %v1385_v12, 0.0 }
 0x6db   :  { %v3082_v33 = vpop.eup %3081  ;;  %v1391_v36 = vadd.f32 1e-05, %v1387_v26 }
 0x6dc   :  { %v1393_v43 = vmul.f32 %v3082_v33, %v3488_v19  ;;  %vm1399_vm7 = vweird.f32 %v3082_v33 }
 0x6dd   :  { %3083 = vrsqrt.f32 %v1391_v36  ;;  %vm1400_vm9 = vmor %vm1398_vm8, %vm1399_vm7  ;;  %vm1408_vm11 = vweird.f32 %v1391_v36 }
 0x6de   :  { %v1394_v48 = vmul.f32 %v3082_v33, %v1393_v43  ;;  %v1497_v43 = vperm.slane %v3505_v24, 4 }
 0x6e0   :  { %v1395_v20 = vmul.f32 0.5, %v1394_v48 }
 0x6e2   :  { %v1396_v59 = vsub.f32 1.5, %v1395_v20  ;;  %v1494_v20 = vperm.slane %v3505_v24, 1 }
 0x6e3   :  { %v3084_v27 = vpop.eup %3083 }
 0x6e4   :  { %v1397_v25 = vmul.f32 %v3082_v33, %v1396_v59  ;;  %v1403_v34 = vmul.f32 %v3084_v27, %v1391_v36  ;;  %vm1409_vm10 = vweird.f32 %v3084_v27 }
 0x6e5   :  { %vm1410_vm12 = vmor %vm1408_vm11, %vm1409_vm10 }
 0x6e6   :  { %v1404_v0 = vmul.f32 %v3084_v27, %v1403_v34  ;;  %v1401_v2 = vsel %vm1400_vm9, %v3082_v33, %v1397_v25 }
 0x6e7   :  { %v1415_v5 = vmul.f32 %v3042_v1, %v1401_v2 }
 0x6e8   :  { %v1405_v3 = vmul.f32 0.5, %v1404_v0 }
 0x6e9   :  { %v1417_v9 = vmul.f32 %v1415_v5, %v1388_v7 }
 0x6ea   :  { %v1406_v4 = vsub.f32 1.5, %v1405_v3 }
 0x6eb   :  { %v1422_v14 = vadd.f32 %v3043_v8, %v1417_v9 }
 0x6ec   :  { %v1407_v6 = vmul.f32 %v3084_v27, %v1406_v4 }
 0x6ee   :  { %v1411_v19 = vsel %vm1410_vm12, %v3084_v27, %v1407_v6 }
 0x6ef   :  { %v1416_v12 = vmul.f32 %v3042_v1, %v1411_v19 }
 0x6f1   :  { %v1418_v13 = vmul.f32 %v1416_v12, %v1389_v10 }
 0x6f3   :  { %v1423_v15 = vadd.f32 %v3043_v8, %v1418_v13 }
 0x6f5   :  { %v1424_v16 = vpack.c.bf16 %v1423_v15, %v1422_v14 }
 0x6f7   :  { %1803 = vmatmul.bf16.vlgmr.msrb.gmra.mxu0 %v1424_v16  ;;  %1817 = vmatmul.bf16.vlgmr.msra.gmra.mxu1 %v1424_v16 }
 0x6f8   :  { %1831 = vmatmul.bf16.vlgmr.msrb.gmra.mxu2 %v1424_v16  ;;  %1845 = vmatmul.bf16.vlgmr.msra.gmra.mxu3 %v1424_v16 }
 0x707   :  { %1859 = vmatmul.bf16.vlgmr.msra.gmra.mxu0 %v1424_v16  ;;  %1873 = vmatmul.bf16.vlgmr.msrb.gmra.mxu1 %v1424_v16 }
 0x708   :  { %1887 = vmatmul.bf16.vlgmr.msra.gmra.mxu2 %v1424_v16 }
 0x774   :  { %v1804_v35 = vpop.f32.mrf.mxu0  ;;  %v1818_v63 = vpop.f32.mrf.mxu1 }
 0x775   :  { %v1805_v45 = vadd.f32 %v1804_v35, %v1493_v38  ;;  %v1819_v57 = vadd.f32 %v1818_v63, %v1494_v20 }
 0x77b   :  { %v1832_v21 = vpop.f32.mrf.mxu2  ;;  %v1846_v22 = vpop.f32.mrf.mxu3 }
 0x77c   :  { %v1806_v37 = vpop.f32.mrf.mxu0  ;;  %v1820_v23 = vpop.f32.mrf.mxu1  ;;  %v1833_v29 = vadd.f32 %v1832_v21, %v1495_v44  ;;  %v1847_v30 = vadd.f32 %v1846_v22, %v1496_v58 }
 0x77d   :  { %v1807_v42 = vadd.f32 %v1806_v37, %v1493_v38  ;;  %v1821_v56 = vadd.f32 %v1820_v23, %v1494_v20 }
 0x77f   :  { %v1893_v47 = vpack.c.bf16 %v1807_v42, %v1805_v45  ;;  %v1933_v59 = vpack.c.bf16 %v1821_v56, %v1819_v57  ;;  %v3021_v45 = vld [vmem:[#allocation10 + $0x30] sm:$0xff] }
 0x783   :  { %v1834_v26 = vpop.f32.mrf.mxu2  ;;  %v1848_v28 = vpop.f32.mrf.mxu3 }
 0x784   :  { %v1835_v31 = vadd.f32 %v1834_v26, %v1495_v44  ;;  %v1849_v32 = vadd.f32 %v1848_v28, %v1496_v58  ;;  %v1860_v33 = vpop.f32.mrf.mxu0  ;;  %v1874_v36 = vpop.f32.mrf.mxu1 }
 0x785   :  { %v1861_v50 = vadd.f32 %v1860_v33, %v1497_v43  ;;  %v1875_v46 = vadd.f32 %v1874_v36, %v1498_v18 }
 0x786   :  { %v1894_v39 = vpack.c.bf16 %v1835_v31, %v1833_v29  ;;  %v1934_v40 = vpack.c.bf16 %v1849_v32, %v1847_v30 }
 0x788   :  { %1903 = vmatpush.bf16.xpose.msrb.mxu3 %v1894_v39 }
 0x78c   :  { %v1862_v48 = vpop.f32.mrf.mxu0  ;;  %v1876_v49 = vpop.f32.mrf.mxu1 }
 0x78d   :  { %v1863_v52 = vadd.f32 %v1862_v48, %v1497_v43  ;;  %v1877_v53 = vadd.f32 %v1876_v49, %v1498_v18  ;;  %v3022_v18 = vld [vmem:[#allocation10 + $0x38] sm:$0xff]  ;;  %v1888_v48 = vpop.f32.mrf.mxu2 }
 0x78f   :  { %v1895_v54 = vpack.c.bf16 %v1863_v52, %v1861_v50  ;;  %v1935_v55 = vpack.c.bf16 %v1877_v53, %v1875_v46  ;;  %1904 = vmatmul.bf16.vlgmr.msrb.gmra.mxu3 %v1893_v47  ;;  %v3020_v47 = vld [vmem:[#allocation10 + $0x28] sm:$0xff]  ;;  %v3019_v46 = vld [vmem:[#allocation10 + $0x20] sm:$0xff]  ;;  %v3018_v53 = vld [vmem:[#allocation10 + $0x18] sm:$0xff] }
 0x790   :  { %1943 = vmatpush.bf16.xpose.msra.mxu3 %v1934_v40 }
 0x791   :  { %1983 = vmatpush.bf16.msrb.mxu0 %v1935_v55  ;;  %2000 = vmatpush.bf16.msra.mxu1 %v1895_v54  ;;  %v1499_v54 = vperm.slane %v3505_v24, 6 }
 0x795   :  { %v1890_v55 = vpop.f32.mrf.mxu2 }
 0x798   :  { %2101 = vmatpush.bf16.msrb.mxu3 %v3022_v18 }
 0x79c   :  { %2102 = vmatpush.bf16.msrb.mxu3 %v3021_v45 }
 0x79f   :  { %1944 = vmatmul.bf16.vlgmr.msra.gmra.mxu3 %v1933_v59  ;;  %v3017_v59 = vld [vmem:[#allocation10 + $0x10] sm:$0xff] }
 0x7a0   :  { %2103 = vmatpush.bf16.msrb.mxu3 %v3020_v47 }
 0x7a4   :  { %2104 = vmatpush.bf16.msrb.mxu3 %v3019_v46 }
 0x7a8   :  { %2105 = vmatpush.bf16.msrb.mxu3 %v3018_v53 }
 0x7ac   :  { %2106 = vmatpush.bf16.msrb.mxu3 %v3017_v59 }
 0x812   :  { %v1905_v60 = vpop.f32.mrf.mxu3 }
 0x813   :  { %v1906_v27 = vadd.f32 %v3451_v41, %v1905_v60  ;;  %v1889_v60 = vadd.f32 %v1888_v48, %v1499_v54 }
 0x815   :  { %v1910_v61 = vsel %vm603_vm0, %v1906_v27, -inf }
 0x816   :  { %1911 = vmax.xlane.f32.xlu2 %v1910_v61  ;;  %v1891_v61 = vadd.f32 %v1890_v55, %v1499_v54 }
 0x81a   :  { %v1907_v62 = vpop.f32.mrf.mxu3 }
 0x81b   :  { %v1908_v25 = vadd.f32 %v3459_v51, %v1907_v62 }
 0x81d   :  { %v1913_v34 = vsel %vm603_vm0, %v1908_v25, -inf }
 0x81e   :  { %1914 = vmax.xlane.f32.xlu0 %v1913_v34  ;;  %v3016_v34 = vld [vmem:[#allocation10 + $0x8] sm:$0xff] }
 0x81f   :  { %2107 = vmatpush.bf16.msrb.mxu3 %v3016_v34 }
 0x822   :  { %v1945_v0 = vpop.f32.mrf.mxu3 }
 0x823   :  { %v1946_v1 = vadd.f32 %v3451_v41, %v1945_v0 }
 0x825   :  { %v1950_v2 = vsel %vm603_vm0, %v1946_v1, -inf }
 0x826   :  { %1951 = vmax.xlane.f32.xlu1 %v1950_v2 }
 0x82a   :  { %v1947_v3 = vpop.f32.mrf.mxu3 }
 0x82b   :  { %v1948_v4 = vadd.f32 %v3459_v51, %v1947_v3  ;;  %v2013_v3 = vld [vmem:[#allocation5] sm:$0x3] }
 0x82d   :  { %v1953_v5 = vsel %vm603_vm0, %v1948_v4, -inf }
 0x82e   :  { %1954 = vmax.xlane.f32.xlu2 %v1953_v5 }
 0x889   :  { %v1912_v6 = vpop.xlane.xlu2 %1911 }
 0x88a   :  { %v1916_v7 = vsub.f32 %v1906_v27, %v1912_v6 }
 0x88c   :  { %v1918_v19 = vmul.f32 1.442695, %v1916_v7 }
 0x88e   :  { %3085 = vpow2.f32 %v1918_v19 }
 0x891   :  { %v1915_v8 = vpop.xlane.xlu0 %1914 }
 0x892   :  { %v1917_v9 = vsub.f32 %v1908_v25, %v1915_v8 }
 0x894   :  { %v3086_v10 = vpop.eup %3085  ;;  %v1920_v12 = vmul.f32 1.442695, %v1917_v9 }
 0x895   :  { %v1922_v13 = vsel %vm603_vm0, %v3086_v10, 0.0 }
 0x896   :  { %3087 = vpow2.f32 %v1920_v12  ;;  %1923 = vadd.xlane.f32.xlu0 %v1922_v13 }
 0x899   :  { %v1952_v41 = vpop.xlane.xlu1 %1951 }
 0x89a   :  { %v1956_v14 = vsub.f32 %v1946_v1, %v1952_v41 }
 0x89c   :  { %v3088_v15 = vpop.eup %3087  ;;  %v1958_v16 = vmul.f32 1.442695, %v1956_v14 }
 0x89d   :  { %v1925_v51 = vsel %vm603_vm0, %v3088_v15, 0.0 }
 0x89e   :  { %3089 = vpow2.f32 %v1958_v16  ;;  %1926 = vadd.xlane.f32.xlu1 %v1925_v51 }
 0x8a1   :  { %v1955_v35 = vpop.xlane.xlu2 %1954 }
 0x8a2   :  { %v1957_v63 = vsub.f32 %v1948_v4, %v1955_v35  ;;  %v2014_v4 = vpack.c.bf16 %v2013_v3, %v2013_v3 }
 0x8a4   :  { %v3090_v21 = vpop.eup %3089  ;;  %v1960_v22 = vmul.f32 1.442695, %v1957_v63 }
 0x8a5   :  { %v1962_v37 = vsel %vm603_vm0, %v3090_v21, 0.0 }
 0x8a6   :  { %3091 = vpow2.f32 %v1960_v22  ;;  %1963 = vadd.xlane.f32.xlu2 %v1962_v37 }
 0x8ac   :  { %v3092_v23 = vpop.eup %3091 }
 0x8ad   :  { %v1965_v44 = vsel %vm603_vm0, %v3092_v23, 0.0 }
 0x8ae   :  { %1966 = vadd.xlane.f32.xlu0 %v1965_v44 }
 0x909   :  { %v1924_v58 = vpop.xlane.xlu0 %1923 }
 0x90a   :  { %3093 = vrcp.f32 %v1924_v58 }
 0x910   :  { %v3094_v28 = vpop.eup %3093 }
 0x911   :  { %v1927_v26 = vpop.xlane.xlu1 %1926  ;;  %v1930_v30 = vmul.f32 %v3094_v28, %v3086_v10 }
 0x912   :  { %3095 = vrcp.f32 %v1927_v26 }
 0x918   :  { %v3096_v29 = vpop.eup %3095 }
 0x919   :  { %v1931_v31 = vmul.f32 %v3096_v29, %v3088_v15  ;;  %v1964_v33 = vpop.xlane.xlu2 %1963 }
 0x91a   :  { %3097 = vrcp.f32 %v1964_v33 }
 0x91b   :  { %v1932_v32 = vpack.c.bf16 %v1931_v31, %v1930_v30 }
 0x91d   :  { %2813 = vmatmul.msk.bf16.vlgmr.msra.gmra.mxu1 %vm603_vm0, %v1932_v32 }
 0x920   :  { %v3098_v38 = vpop.eup %3097 }
 0x921   :  { %v1967_v36 = vpop.xlane.xlu0 %1966  ;;  %v1970_v40 = vmul.f32 %v3098_v38, %v3090_v21 }
 0x922   :  { %3099 = vrcp.f32 %v1967_v36 }
 0x928   :  { %v3100_v39 = vpop.eup %3099 }
 0x929   :  { %v1971_v42 = vmul.f32 %v3100_v39, %v3092_v23 }
 0x92b   :  { %v1972_v43 = vpack.c.bf16 %v1971_v42, %v1970_v40 }
 0x92d   :  { %2812 = vmatmul.msk.bf16.vlgmr.msrb.gmra.mxu0 %vm603_vm0, %v1972_v43 }
 0x99a   :  { %v2002_v49 = vpop.f32.mrf.mxu1 }
 0x9a2   :  { %v2004_v56 = vpop.f32.mrf.mxu1 }
 0x9aa   :  { %v1985_v50 = vpop.f32.mrf.mxu0 }
 0x9ab   :  { %v2003_v52 = vadd.f32 %v2002_v49, %v1985_v50 }
 0x9ad   :  { %v2007_v20 = vmul.f32 %v2003_v52, %v3404_v11  ;;  %v3015_v11 = vld [vmem:[#allocation10] sm:$0xff] }
 0x9ae   :  { %2108 = vmatpush.bf16.msrb.mxu3 %v3015_v11 }
 0x9af   :  { %v2009_v62 = vadd.f32 %v2007_v20, %v1889_v60 }
 0x9b1   :  { %v2011_v1 = vmax.f32 %v2009_v62, 0.0 }
 0x9b2   :  { %v1987_v57 = vpop.f32.mrf.mxu0 }
 0x9b3   :  { %v2005_v27 = vadd.f32 %v2004_v56, %v1987_v57 }
 0x9b5   :  { %v2008_v25 = vmul.f32 %v2005_v27, %v3409_v17  ;;  %v3044_v17 = vld [vmem:[%s3546_s9] ss:$0 sm:$0xff] }
 0x9b7   :  { %v2010_v0 = vadd.f32 %v2008_v25, %v1891_v61 }
 0x9b9   :  { %v2012_v2 = vmax.f32 %v2010_v0, 0.0 }
 0x9bb   :  { %v2015_v24 = vpack.c.bf16 %v2012_v2, %v2011_v1 }
 0x9bd   :  { %2026 = vmatpush.bf16.msrb.mxu2 %v2015_v24 }
 0x9c0   :  { %2814 = vmatmul.msk.bf16.vlgmr.msrb.gmra.mxu2 %vm603_vm0, %v2014_v4 }
 0xa43   :  { %v2028_v5 = vpop.f32.mrf.mxu2 }
 0xa44   :  { %v2032_v6 = vpack.c.bf16 %v2028_v5, %v2028_v5 }
 0xa46   :  { %2109 = vmatmul.bf16.vlgmr.msrb.gmra.mxu3 %v2032_v6 }
 0xa4b   :  { %v2030_v7 = vpop.f32.mrf.mxu2 }
 0xac9   :  { %v2110_v19 = vpop.f32.mrf.mxu3 }
 0xaca   :  { %v2111_v8 = vadd.f32 %v3044_v17, %v2110_v19 }
 0xacc   :  { %2114 = vst [vmem:[#allocation11] sm:$0x3] %v2111_v8 }
 0xacd   :  { %2125 = dma.vmem_to_hbm [thread:$0]  %s2121_s14, 32, %s2123_s17, [#allocation4]  }
 0xad1   :  { %v2112_v9 = vpop.f32.mrf.mxu3 }
 0xad2   :  { %3253 = dma.done.wait [#allocation4], 32  }
 0xad3   :  { %3254 = vsyncadd [#allocation4], 4294967264 }
 0xad4   :  { %2130 = vsyncpa [#allocation3], 1 }
 0xad5   :  { %2131 = vsyncpa [#allocation6], 1 }
 0xad6   :  { %2132 = vsyncpa [#allocation9], 1 }
 0xad7   :  { %2133 = vsyncpa [#allocation4], 1 }

</bundles_post_ra>
